<compile_context>
chip_gen: v7x
topology: tpu7x:2x2x1
jax: 0.10.0
libtpu: 0.0.40
codegen_flags: <defaults>
</compile_context>

<pallas_src>
import functools

import numpy as np

import jax
import jax.numpy as jnp
from jax import lax
from jax.experimental import pallas as pl
from jax.experimental.pallas import tpu as pltpu

EPS = 1e-5
_VMEM_LIMIT = 64 * 1024 * 1024


# ----------------------------------------------------------------------------
# Shared helpers
# ----------------------------------------------------------------------------
def _const_spec(shape, single_buffer):
    """BlockSpec for an operand whose block is identical for every grid step."""
    index_map = lambda *_: (0,) * len(shape)
    if single_buffer:
        # Constant blocks never change across the grid -> no double buffering
        # (saves a full extra VMEM copy per weight, important on v7x's 64 MiB).
        return pl.BlockSpec(shape, index_map, pipeline_mode=pl.Buffered(1))
    return pl.BlockSpec(shape, index_map)


def _shift_minus(p, axis):
    """s[..., i, ...] = p[..., i-1, ...], zero at i == 0 (reads the -1 tap)."""
    z = jnp.zeros_like(lax.slice_in_dim(p, 0, 1, axis=axis))
    body = lax.slice_in_dim(p, 0, p.shape[axis] - 1, axis=axis)
    return jnp.concatenate([z, body], axis=axis)


def _shift_plus(p, axis):
    """s[..., i, ...] = p[..., i+1, ...], zero at i == n-1 (reads the +1 tap)."""
    z = jnp.zeros_like(lax.slice_in_dim(p, 0, 1, axis=axis))
    body = lax.slice_in_dim(p, 1, p.shape[axis], axis=axis)
    return jnp.concatenate([body, z], axis=axis)


# ----------------------------------------------------------------------------
# Channels-last MXU path (C >= 128): one sample per grid step
# ----------------------------------------------------------------------------
def _resblock_cl_kernel(x_ref, w1_ref, g1_ref, b1_ref, w2_ref, g2_ref, b2_ref,
                        o_ref, xpad_ref, ypad_ref, *, H, W, C):
    """Channels-last residual block, one batch sample per grid step.

    x_ref   : (1, H, W, C)   input sample, C on the 128-lane axis
    w*_ref  : (3, 3C, C)     conv weights, the 3 kx taps stacked along Cin
    g*/b*   : (1, C)         InstanceNorm affine parameters
    o_ref   : (1, H, W, C)   output sample
    xpad/ypad_ref : (H+2, W, C) f32 scratch, zero-padded along H only
    """
    HW = H * W
    inv_hw = 1.0 / float(HW)
    zrow = jnp.zeros((W, C), jnp.float32)

    # Border-only zeroing: just the two halo rows along H.  (The W halo never
    # exists as data; it is realized by the shifted copies below.)  Done every
    # step because each TensorCore owns its own scratch under megacore.
    xpad_ref[0] = zrow
    xpad_ref[H + 1] = zrow
    ypad_ref[0] = zrow
    ypad_ref[H + 1] = zrow

    x = x_ref[0].astype(jnp.float32)          # (H, W, C)
    xpad_ref[1:H + 1] = x                     # aligned: H is an untiled axis

    def conv3x3(pad_ref, w_ref):
        p = pad_ref[...]                                          # (H+2, W, C)
        # kx taps [reads x-1, x, x+1]; zero edge columns built into the shifts.
        band = jnp.concatenate(
            [_shift_minus(p, 1), p, _shift_plus(p, 1)], axis=-1)  # (H+2, W, 3C)
        acc = jnp.zeros((HW, C), jnp.float32)
        for ky in range(3):                   # ky taps: aligned outer-axis slices
            lhs = band[ky:ky + H].reshape(HW, 3 * C)
            acc = acc + jnp.dot(lhs, w_ref[ky],
                                preferred_element_type=jnp.float32)
        return acc                                                # (HW, C)

    def inst_norm(y, g_ref, b_ref):
        # Single-pass biased statistics over the spatial (sublane) axis.
        s = jnp.sum(y, axis=0, keepdims=True)                     # (1, C)
        ss = jnp.sum(y * y, axis=0, keepdims=True)                # (1, C)
        mean = s * inv_hw
        var = ss * inv_hw - mean * mean
        scale = lax.rsqrt(var + EPS) * g_ref[...]
        return (y - mean) * scale + b_ref[...]

    # conv1 -> InstanceNorm -> ReLU
    y1 = jnp.maximum(inst_norm(conv3x3(xpad_ref, w1_ref), g1_ref, b1_ref), 0.0)
    ypad_ref[1:H + 1] = y1.reshape(H, W, C)

    # conv2 -> InstanceNorm -> residual add from the unpadded input
    y2 = inst_norm(conv3x3(ypad_ref, w2_ref), g2_ref, b2_ref) + x.reshape(HW, C)

    # Single lane-dense store of the whole sample.
    o_ref[0] = y2.reshape(H, W, C).astype(o_ref.dtype)


def _fused_kx_weights(w):
    """PyTorch (Cout, Cin, 3, 3) -> (ky, kx*Cin, Cout) for K = 3*Cin matmuls."""
    co, ci = w.shape[0], w.shape[1]
    wt = jnp.transpose(w, (2, 3, 1, 0))            # (ky, kx, Cin, Cout)
    return wt.reshape(3, 3 * ci, co).astype(jnp.float32)


def _run_channels_last(x, w1, g1, b1, w2, g2, b2):
    N, C, H, W = x.shape
    x_nhwc = jnp.transpose(x, (0, 2, 3, 1))

    w1f = _fused_kx_weights(w1)
    w2f = _fused_kx_weights(w2)
    g1v = g1.reshape(1, C).astype(jnp.float32)
    b1v = b1.reshape(1, C).astype(jnp.float32)
    g2v = g2.reshape(1, C).astype(jnp.float32)
    b2v = b2.reshape(1, C).astype(jnp.float32)

    kernel = functools.partial(_resblock_cl_kernel, H=H, W=W, C=C)

    def run(single_buffer):
        cs = lambda s: _const_spec(s, single_buffer)
        return pl.pallas_call(
            kernel,
            out_shape=jax.ShapeDtypeStruct((N, H, W, C), x.dtype),
            grid=(N,),
            in_specs=[
                pl.BlockSpec((1, H, W, C), lambda n: (n, 0, 0, 0)),   # x
                cs((3, 3 * C, C)), cs((1, C)), cs((1, C)),            # conv1/IN1
                cs((3, 3 * C, C)), cs((1, C)), cs((1, C)),            # conv2/IN2
            ],
            out_specs=pl.BlockSpec((1, H, W, C), lambda n: (n, 0, 0, 0)),
            scratch_shapes=[pltpu.VMEM((H + 2, W, C), jnp.float32),   # padded x
                            pltpu.VMEM((H + 2, W, C), jnp.float32)],  # padded y1
            compiler_params=pltpu.CompilerParams(
                dimension_semantics=("parallel",),
                vmem_limit_bytes=_VMEM_LIMIT),
        )(x_nhwc, w1f, g1v, b1v, w2f, g2v, b2v)

    try:
        out_nhwc = jax.block_until_ready(run(True))
    except Exception:  # pl.Buffered(1) unsupported on this jax -> double buffer
        out_nhwc = run(False)
    return jnp.transpose(out_nhwc, (0, 3, 1, 2))


# ----------------------------------------------------------------------------
# Small-C path (C < 128): channels folded into the lane axis (last dim = W*C)
# ----------------------------------------------------------------------------
def _resblock_small_kernel(x_ref, w1_ref, g1_ref, b1_ref, w2_ref, g2_ref,
                           b2_ref, sel_ref, selt_ref, o_ref, *, B, H, W, C):
    """Lane-folded residual block; B samples per grid step.

    x_ref   : (B, H, W*C)       input block, W*C on the lane axis
    w*_ref  : (3, W*C, W*C)     banded weights; the 3 kx taps and the zero
                                padding along W are baked into the band
    g*/b*   : (1, C)            InstanceNorm affine parameters
    sel     : (W*C, C) / selt: (C, W*C)  0/1 channel selection matrices
    o_ref   : (B, H, W*C)
    """
    WC = W * C
    inv_hw = 1.0 / float(H * W)

    x = x_ref[...].astype(jnp.float32)                            # (B, H, WC)

    def conv3x3(p, w_ref):
        # ky taps: shift-by-one row copies carrying their zero row with them.
        taps = (_shift_minus(p, 1), p, _shift_plus(p, 1))
        acc = jnp.zeros((B * H, WC), jnp.float32)
        for ky in range(3):
            acc = acc + jnp.dot(taps[ky].reshape(B * H, WC), w_ref[ky],
                                preferred_element_type=jnp.float32)
        return acc.reshape(B, H, WC)

    def inst_norm(y, g_ref, b_ref):
        # Per-sample/per-channel stats; channel reduce and lane broadcast go
        # through tiny selection matmuls so everything stays lane-dense.
        s = jnp.dot(jnp.sum(y, axis=1), sel_ref[...],
                    preferred_element_type=jnp.float32)            # (B, C)
        ss = jnp.dot(jnp.sum(y * y, axis=1), sel_ref[...],
                     preferred_element_type=jnp.float32)           # (B, C)
        mean = s * inv_hw
        var = ss * inv_hw - mean * mean
        scale_c = lax.rsqrt(var + EPS) * g_ref[...]                # (B, C)
        shift_c = b_ref[...] - mean * scale_c                      # (B, C)
        scale_l = jnp.dot(scale_c, selt_ref[...],
                          preferred_element_type=jnp.float32)      # (B, WC)
        shift_l = jnp.dot(shift_c, selt_ref[...],
                          preferred_element_type=jnp.float32)      # (B, WC)
        return y * scale_l.reshape(B, 1, WC) + shift_l.reshape(B, 1, WC)

    y1 = jnp.maximum(inst_norm(conv3x3(x, w1_ref), g1_ref, b1_ref), 0.0)
    y2 = inst_norm(conv3x3(y1, w2_ref), g2_ref, b2_ref) + x
    o_ref[...] = y2.astype(o_ref.dtype)


def _banded_weights(w, W):
    """PyTorch (Cout, Cin, 3, 3) -> (ky, W*Cin, W*Cout) banded matrices.

    band[ky, xi*Cin + ci, xo*Cout + co] = w[co, ci, ky, xi - xo + 1] inside the
    3-wide band (zero elsewhere), so one matmul per ky applies all three kx
    taps and the zero padding along W at once.
    """
    co, ci = w.shape[0], w.shape[1]
    wt = jnp.transpose(w, (2, 3, 1, 0)).astype(jnp.float32)   # (ky, kx, Ci, Co)
    m = np.zeros((3, W, W), np.float32)
    for kx in range(3):
        for xo in range(W):
            xi = xo + kx - 1
            if 0 <= xi < W:
                m[kx, xi, xo] = 1.0
    band = jnp.einsum("axy,kaco->kxcyo", jnp.asarray(m), wt)  # (ky, Xi, Ci, Xo, Co)
    return band.reshape(3, W * ci, W * co)


def _run_small_c(x, w1, g1, b1, w2, g2, b2):
    N, C, H, W = x.shape
    WC = W * C
    x_flat = jnp.transpose(x, (0, 2, 3, 1)).reshape(N, H, WC)

    band1 = _banded_weights(w1, W)
    band2 = _banded_weights(w2, W)
    sel = jnp.tile(jnp.eye(C, dtype=jnp.float32), (W, 1))      # (WC, C)
    selt = sel.T                                               # (C, WC)
    g1v = g1.reshape(1, C).astype(jnp.float32)
    b1v = b1.reshape(1, C).astype(jnp.float32)
    g2v = g2.reshape(1, C).astype(jnp.float32)
    b2v = b2.reshape(1, C).astype(jnp.float32)

    # Several samples per grid step: amortizes per-step overhead and grows the
    # matmul M dimension to B*H.
    bb = N if N * H * WC * 4 <= (4 << 20) else 1
    grid = (pl.cdiv(N, bb),)

    kernel = functools.partial(_resblock_small_kernel, B=bb, H=H, W=W, C=C)

    def run(single_buffer):
        cs = lambda s: _const_spec(s, single_buffer)
        return pl.pallas_call(
            kernel,
            out_shape=jax.ShapeDtypeStruct((N, H, WC), x.dtype),
            grid=grid,
            in_specs=[
                pl.BlockSpec((bb, H, WC), lambda n: (n, 0, 0)),       # x
                cs((3, WC, WC)), cs((1, C)), cs((1, C)),              # conv1/IN1
                cs((3, WC, WC)), cs((1, C)), cs((1, C)),              # conv2/IN2
                cs((WC, C)), cs((C, WC)),                             # sel / selT
            ],
            out_specs=pl.BlockSpec((bb, H, WC), lambda n: (n, 0, 0)),
            compiler_params=pltpu.CompilerParams(
                dimension_semantics=("parallel",),
                vmem_limit_bytes=_VMEM_LIMIT),
        )(x_flat, band1, g1v, b1v, band2, g2v, b2v, sel, selt)

    try:
        out_flat = jax.block_until_ready(run(True))
    except Exception:  # pl.Buffered(1) unsupported on this jax -> double buffer
        out_flat = run(False)
    return jnp.transpose(out_flat.reshape(N, H, W, C), (0, 3, 1, 2))


# ----------------------------------------------------------------------------
# Public entry point + reference
# ----------------------------------------------------------------------------
def residual_conv_block(x, w1, g1, b1, w2, g2, b2):
    """x: (N, C, H, W) NCHW in / out (PyTorch layout)."""
    _, C, _, W = x.shape
    if C < 128 and W * C <= 512:
        # Channels-on-lanes would leave most of the 128 lanes and the MXU idle
        # at these shapes; use the lane-folded banded-matmul path instead.
        return _run_small_c(x, w1, g1, b1, w2, g2, b2)
    return _run_channels_last(x, w1, g1, b1, w2, g2, b2)


def _reference(x, w1, g1, b1, w2, g2, b2):
    def conv(v, w):
        return lax.conv_general_dilated(
            v, w, (1, 1), "SAME",
            dimension_numbers=("NCHW", "OIHW", "NCHW"),
            precision=lax.Precision.HIGHEST)

    def inorm(y, g, b):
        m = jnp.mean(y, axis=(2, 3), keepdims=True)
        v = jnp.mean((y - m) ** 2, axis=(2, 3), keepdims=True)
        return ((y - m) / jnp.sqrt(v + EPS)
                * g[None, :, None, None] + b[None, :, None, None])

    y = jnp.maximum(inorm(conv(x, w1), g1, b1), 0.0)
    y = inorm(conv(y, w2), g2, b2)
    return y + x


if __name__ == "__main__":
    def _make_inputs(key, N, C, H, W):
        k = jax.random.split(key, 7)
        x = jax.random.normal(k[0], (N, C, H, W), jnp.float32)
        w1 = 0.2 * jax.random.normal(k[1], (C, C, 3, 3), jnp.float32)
        w2 = 0.2 * jax.random.normal(k[2], (C, C, 3, 3), jnp.float32)
        g1 = 1.0 + 0.1 * jax.random.normal(k[3], (C,), jnp.float32)
        b1 = 0.1 * jax.random.normal(k[4], (C,), jnp.float32)
        g2 = 1.0 + 0.1 * jax.random.normal(k[5], (C,), jnp.float32)
        b2 = 0.1 * jax.random.normal(k[6], (C,), jnp.float32)
        return (x, w1, g1, b1, w2, g2, b2)

    key = jax.random.PRNGKey(0)
    k_small, k_big = jax.random.split(key)

    # Test shape implied by the module (exercises the lane-folded small-C path).
    args = _make_inputs(k_small, 2, 4, 16, 16)
    out = jax.block_until_ready(residual_conv_block(*args))
    ref = _reference(*args)
    assert out.shape == args[0].shape and out.dtype == args[0].dtype
    err = float(jnp.max(jnp.abs(out - ref)))
    assert jnp.allclose(out, ref, atol=1e-4, rtol=1e-4), err

    # Wider-channel shape (exercises the channels-last MXU path).
    args2 = _make_inputs(k_big, 2, 128, 16, 16)
    out2 = jax.block_until_ready(residual_conv_block(*args2))
    ref2 = _reference(*args2)
    assert out2.shape == args2[0].shape and out2.dtype == args2[0].dtype
    err2 = float(jnp.max(jnp.abs(out2 - ref2)))
    assert jnp.allclose(out2, ref2, atol=1e-4, rtol=1e-4), err2

    # TODO(synk): running_mean/running_var buffer updates (track_running_stats
    # side effect) are training-time state mutation and are not modeled here.
    print("KERNEL_OK")
</pallas_src>

<mosaic_0001>
module attributes {stable_mosaic.version = 11 : i64} {
  func.func @_resblock_small_kernel(%arg0: i32, %arg1: memref<2x16x64xf32, #tpu.memory_space<vmem>>, %arg2: memref<3x64x64xf32, #tpu.memory_space<vmem>>, %arg3: memref<1x4xf32, #tpu.memory_space<vmem>>, %arg4: memref<1x4xf32, #tpu.memory_space<vmem>>, %arg5: memref<3x64x64xf32, #tpu.memory_space<vmem>>, %arg6: memref<1x4xf32, #tpu.memory_space<vmem>>, %arg7: memref<1x4xf32, #tpu.memory_space<vmem>>, %arg8: memref<64x4xf32, #tpu.memory_space<vmem>>, %arg9: memref<4x64xf32, #tpu.memory_space<vmem>>, %arg10: memref<2x16x64xf32, #tpu.memory_space<vmem>>) attributes {dimension_semantics = [#tpu.dimension_semantics<parallel>], iteration_bounds = array<i64: 1>, scalar_prefetch = 0 : i64, scratch_operands = 0 : i64, tpu.core_type = #tpu.core_type<tc>, window_params = [{transform_indices = @transform_0, window_bounds = array<i64: 2, 16, 64>}, {pipeline_mode = #tpu.pipeline_mode<synchronous>, transform_indices = @transform_1, window_bounds = array<i64: 3, 64, 64>}, {pipeline_mode = #tpu.pipeline_mode<synchronous>, transform_indices = @transform_2, window_bounds = array<i64: 1, 4>}, {pipeline_mode = #tpu.pipeline_mode<synchronous>, transform_indices = @transform_3, window_bounds = array<i64: 1, 4>}, {pipeline_mode = #tpu.pipeline_mode<synchronous>, transform_indices = @transform_4, window_bounds = array<i64: 3, 64, 64>}, {pipeline_mode = #tpu.pipeline_mode<synchronous>, transform_indices = @transform_5, window_bounds = array<i64: 1, 4>}, {pipeline_mode = #tpu.pipeline_mode<synchronous>, transform_indices = @transform_6, window_bounds = array<i64: 1, 4>}, {pipeline_mode = #tpu.pipeline_mode<synchronous>, transform_indices = @transform_7, window_bounds = array<i64: 64, 4>}, {pipeline_mode = #tpu.pipeline_mode<synchronous>, transform_indices = @transform_8, window_bounds = array<i64: 4, 64>}, {transform_indices = @transform_9, window_bounds = array<i64: 2, 16, 64>}]} {
    %c0 = arith.constant 0 : index
    %c0_0 = arith.constant 0 : index
    %c0_1 = arith.constant 0 : index
    %0 = vector.load %arg1[%c0, %c0_0, %c0_1] : memref<2x16x64xf32, #tpu.memory_space<vmem>>, vector<2x16x64xf32>
    %cst = arith.constant 0.000000e+00 : f32
    %1 = vector.broadcast %cst : f32 to vector<2x1x64xf32>
    %2 = vector.extract_strided_slice %0 {offsets = [0, 0, 0], sizes = [2, 15, 64], strides = [1, 1, 1]} : vector<2x16x64xf32> to vector<2x15x64xf32>
    %3 = tpu.concatenate %1, %2 in 1 : vector<2x1x64xf32>, vector<2x15x64xf32> -> vector<2x16x64xf32>
    %cst_2 = arith.constant 0.000000e+00 : f32
    %4 = vector.broadcast %cst_2 : f32 to vector<2x1x64xf32>
    %5 = vector.extract_strided_slice %0 {offsets = [0, 1, 0], sizes = [2, 15, 64], strides = [1, 1, 1]} : vector<2x16x64xf32> to vector<2x15x64xf32>
    %6 = tpu.concatenate %5, %4 in 1 : vector<2x15x64xf32>, vector<2x1x64xf32> -> vector<2x16x64xf32>
    %cst_3 = arith.constant 0.000000e+00 : f32
    %7 = vector.broadcast %cst_3 : f32 to vector<32x64xf32>
    %8 = vector.shape_cast %3 : vector<2x16x64xf32> to vector<32x64xf32>
    %c0_4 = arith.constant 0 : index
    %c0_5 = arith.constant 0 : index
    %c0_6 = arith.constant 0 : index
    %9 = vector.load %arg2[%c0_4, %c0_5, %c0_6] : memref<3x64x64xf32, #tpu.memory_space<vmem>>, vector<1x64x64xf32>
    %10 = vector.shape_cast %9 : vector<1x64x64xf32> to vector<64x64xf32>
    %cst_7 = arith.constant dense<0.000000e+00> : vector<32x64xf32>
    %11 = tpu.matmul %8, %10, %cst_7 {dimension_numbers = #tpu.dot_dimension_numbers<[1], [0], [0], [1], [0, 0, 1, 1], [], []>} : vector<32x64xf32>, vector<64x64xf32>, vector<32x64xf32> -> vector<32x64xf32>
    %12 = arith.addf %7, %11 : vector<32x64xf32>
    %13 = vector.shape_cast %0 : vector<2x16x64xf32> to vector<32x64xf32>
    %c1 = arith.constant 1 : index
    %c0_8 = arith.constant 0 : index
    %c0_9 = arith.constant 0 : index
    %14 = vector.load %arg2[%c1, %c0_8, %c0_9] : memref<3x64x64xf32, #tpu.memory_space<vmem>>, vector<1x64x64xf32>
    %15 = vector.shape_cast %14 : vector<1x64x64xf32> to vector<64x64xf32>
    %cst_10 = arith.constant dense<0.000000e+00> : vector<32x64xf32>
    %16 = tpu.matmul %13, %15, %cst_10 {dimension_numbers = #tpu.dot_dimension_numbers<[1], [0], [0], [1], [0, 0, 1, 1], [], []>} : vector<32x64xf32>, vector<64x64xf32>, vector<32x64xf32> -> vector<32x64xf32>
    %17 = arith.addf %12, %16 : vector<32x64xf32>
    %18 = vector.shape_cast %6 : vector<2x16x64xf32> to vector<32x64xf32>
    %c2 = arith.constant 2 : index
    %c0_11 = arith.constant 0 : index
    %c0_12 = arith.constant 0 : index
    %19 = vector.load %arg2[%c2, %c0_11, %c0_12] : memref<3x64x64xf32, #tpu.memory_space<vmem>>, vector<1x64x64xf32>
    %20 = vector.shape_cast %19 : vector<1x64x64xf32> to vector<64x64xf32>
    %cst_13 = arith.constant dense<0.000000e+00> : vector<32x64xf32>
    %21 = tpu.matmul %18, %20, %cst_13 {dimension_numbers = #tpu.dot_dimension_numbers<[1], [0], [0], [1], [0, 0, 1, 1], [], []>} : vector<32x64xf32>, vector<64x64xf32>, vector<32x64xf32> -> vector<32x64xf32>
    %22 = arith.addf %17, %21 : vector<32x64xf32>
    %23 = vector.shape_cast %22 : vector<32x64xf32> to vector<2x16x64xf32>
    %cst_14 = arith.constant dense<0.000000e+00> : vector<2x64xf32>
    %24 = vector.multi_reduction <add>, %23, %cst_14 [1] : vector<2x16x64xf32> to vector<2x64xf32>
    %c0_15 = arith.constant 0 : index
    %c0_16 = arith.constant 0 : index
    %25 = vector.load %arg8[%c0_15, %c0_16] : memref<64x4xf32, #tpu.memory_space<vmem>>, vector<64x4xf32>
    %cst_17 = arith.constant dense<0.000000e+00> : vector<2x4xf32>
    %26 = tpu.matmul %24, %25, %cst_17 {dimension_numbers = #tpu.dot_dimension_numbers<[1], [0], [0], [1], [0, 0, 1, 1], [], []>} : vector<2x64xf32>, vector<64x4xf32>, vector<2x4xf32> -> vector<2x4xf32>
    %27 = arith.mulf %23, %23 : vector<2x16x64xf32>
    %cst_18 = arith.constant dense<0.000000e+00> : vector<2x64xf32>
    %28 = vector.multi_reduction <add>, %27, %cst_18 [1] : vector<2x16x64xf32> to vector<2x64xf32>
    %c0_19 = arith.constant 0 : index
    %c0_20 = arith.constant 0 : index
    %29 = vector.load %arg8[%c0_19, %c0_20] : memref<64x4xf32, #tpu.memory_space<vmem>>, vector<64x4xf32>
    %cst_21 = arith.constant dense<0.000000e+00> : vector<2x4xf32>
    %30 = tpu.matmul %28, %29, %cst_21 {dimension_numbers = #tpu.dot_dimension_numbers<[1], [0], [0], [1], [0, 0, 1, 1], [], []>} : vector<2x64xf32>, vector<64x4xf32>, vector<2x4xf32> -> vector<2x4xf32>
    %cst_22 = arith.constant 3.906250e-03 : f32
    %31 = vector.broadcast %cst_22 : f32 to vector<2x4xf32>
    %32 = arith.mulf %26, %31 : vector<2x4xf32>
    %cst_23 = arith.constant 3.906250e-03 : f32
    %33 = vector.broadcast %cst_23 : f32 to vector<2x4xf32>
    %34 = arith.mulf %30, %33 : vector<2x4xf32>
    %35 = arith.mulf %32, %32 : vector<2x4xf32>
    %36 = arith.subf %34, %35 : vector<2x4xf32>
    %cst_24 = arith.constant 9.99999974E-6 : f32
    %37 = vector.broadcast %cst_24 : f32 to vector<2x4xf32>
    %38 = arith.addf %36, %37 : vector<2x4xf32>
    %39 = math.rsqrt %38 : vector<2x4xf32>
    %c0_25 = arith.constant 0 : index
    %c0_26 = arith.constant 0 : index
    %40 = vector.load %arg3[%c0_25, %c0_26] : memref<1x4xf32, #tpu.memory_space<vmem>>, vector<1x4xf32>
    %41 = vector.broadcast %40 : vector<1x4xf32> to vector<2x4xf32>
    %42 = arith.mulf %39, %41 : vector<2x4xf32>
    %c0_27 = arith.constant 0 : index
    %c0_28 = arith.constant 0 : index
    %43 = vector.load %arg4[%c0_27, %c0_28] : memref<1x4xf32, #tpu.memory_space<vmem>>, vector<1x4xf32>
    %44 = arith.mulf %32, %42 : vector<2x4xf32>
    %45 = vector.broadcast %43 : vector<1x4xf32> to vector<2x4xf32>
    %46 = arith.subf %45, %44 : vector<2x4xf32>
    %c0_29 = arith.constant 0 : index
    %c0_30 = arith.constant 0 : index
    %47 = vector.load %arg9[%c0_29, %c0_30] : memref<4x64xf32, #tpu.memory_space<vmem>>, vector<4x64xf32>
    %cst_31 = arith.constant dense<0.000000e+00> : vector<2x64xf32>
    %48 = tpu.matmul %42, %47, %cst_31 {dimension_numbers = #tpu.dot_dimension_numbers<[1], [0], [0], [1], [0, 0, 1, 1], [], []>} : vector<2x4xf32>, vector<4x64xf32>, vector<2x64xf32> -> vector<2x64xf32>
    %c0_32 = arith.constant 0 : index
    %c0_33 = arith.constant 0 : index
    %49 = vector.load %arg9[%c0_32, %c0_33] : memref<4x64xf32, #tpu.memory_space<vmem>>, vector<4x64xf32>
    %cst_34 = arith.constant dense<0.000000e+00> : vector<2x64xf32>
    %50 = tpu.matmul %46, %49, %cst_34 {dimension_numbers = #tpu.dot_dimension_numbers<[1], [0], [0], [1], [0, 0, 1, 1], [], []>} : vector<2x4xf32>, vector<4x64xf32>, vector<2x64xf32> -> vector<2x64xf32>
    %51 = vector.shape_cast %48 : vector<2x64xf32> to vector<2x1x64xf32>
    %52 = vector.broadcast %51 : vector<2x1x64xf32> to vector<2x16x64xf32>
    %53 = arith.mulf %23, %52 : vector<2x16x64xf32>
    %54 = vector.shape_cast %50 : vector<2x64xf32> to vector<2x1x64xf32>
    %55 = vector.broadcast %54 : vector<2x1x64xf32> to vector<2x16x64xf32>
    %56 = arith.addf %53, %55 : vector<2x16x64xf32>
    %cst_35 = arith.constant 0.000000e+00 : f32
    %57 = vector.broadcast %cst_35 : f32 to vector<2x16x64xf32>
    %58 = arith.maximumf %56, %57 : vector<2x16x64xf32>
    %cst_36 = arith.constant 0.000000e+00 : f32
    %59 = vector.broadcast %cst_36 : f32 to vector<2x1x64xf32>
    %60 = vector.extract_strided_slice %58 {offsets = [0, 0, 0], sizes = [2, 15, 64], strides = [1, 1, 1]} : vector<2x16x64xf32> to vector<2x15x64xf32>
    %61 = tpu.concatenate %59, %60 in 1 : vector<2x1x64xf32>, vector<2x15x64xf32> -> vector<2x16x64xf32>
    %cst_37 = arith.constant 0.000000e+00 : f32
    %62 = vector.broadcast %cst_37 : f32 to vector<2x1x64xf32>
    %63 = vector.extract_strided_slice %58 {offsets = [0, 1, 0], sizes = [2, 15, 64], strides = [1, 1, 1]} : vector<2x16x64xf32> to vector<2x15x64xf32>
    %64 = tpu.concatenate %63, %62 in 1 : vector<2x15x64xf32>, vector<2x1x64xf32> -> vector<2x16x64xf32>
    %cst_38 = arith.constant 0.000000e+00 : f32
    %65 = vector.broadcast %cst_38 : f32 to vector<32x64xf32>
    %66 = vector.shape_cast %61 : vector<2x16x64xf32> to vector<32x64xf32>
    %c0_39 = arith.constant 0 : index
    %c0_40 = arith.constant 0 : index
    %c0_41 = arith.constant 0 : index
    %67 = vector.load %arg5[%c0_39, %c0_40, %c0_41] : memref<3x64x64xf32, #tpu.memory_space<vmem>>, vector<1x64x64xf32>
    %68 = vector.shape_cast %67 : vector<1x64x64xf32> to vector<64x64xf32>
    %cst_42 = arith.constant dense<0.000000e+00> : vector<32x64xf32>
    %69 = tpu.matmul %66, %68, %cst_42 {dimension_numbers = #tpu.dot_dimension_numbers<[1], [0], [0], [1], [0, 0, 1, 1], [], []>} : vector<32x64xf32>, vector<64x64xf32>, vector<32x64xf32> -> vector<32x64xf32>
    %70 = arith.addf %65, %69 : vector<32x64xf32>
    %71 = vector.shape_cast %58 : vector<2x16x64xf32> to vector<32x64xf32>
    %c1_43 = arith.constant 1 : index
    %c0_44 = arith.constant 0 : index
    %c0_45 = arith.constant 0 : index
    %72 = vector.load %arg5[%c1_43, %c0_44, %c0_45] : memref<3x64x64xf32, #tpu.memory_space<vmem>>, vector<1x64x64xf32>
    %73 = vector.shape_cast %72 : vector<1x64x64xf32> to vector<64x64xf32>
    %cst_46 = arith.constant dense<0.000000e+00> : vector<32x64xf32>
    %74 = tpu.matmul %71, %73, %cst_46 {dimension_numbers = #tpu.dot_dimension_numbers<[1], [0], [0], [1], [0, 0, 1, 1], [], []>} : vector<32x64xf32>, vector<64x64xf32>, vector<32x64xf32> -> vector<32x64xf32>
    %75 = arith.addf %70, %74 : vector<32x64xf32>
    %76 = vector.shape_cast %64 : vector<2x16x64xf32> to vector<32x64xf32>
    %c2_47 = arith.constant 2 : index
    %c0_48 = arith.constant 0 : index
    %c0_49 = arith.constant 0 : index
    %77 = vector.load %arg5[%c2_47, %c0_48, %c0_49] : memref<3x64x64xf32, #tpu.memory_space<vmem>>, vector<1x64x64xf32>
    %78 = vector.shape_cast %77 : vector<1x64x64xf32> to vector<64x64xf32>
    %cst_50 = arith.constant dense<0.000000e+00> : vector<32x64xf32>
    %79 = tpu.matmul %76, %78, %cst_50 {dimension_numbers = #tpu.dot_dimension_numbers<[1], [0], [0], [1], [0, 0, 1, 1], [], []>} : vector<32x64xf32>, vector<64x64xf32>, vector<32x64xf32> -> vector<32x64xf32>
    %80 = arith.addf %75, %79 : vector<32x64xf32>
    %81 = vector.shape_cast %80 : vector<32x64xf32> to vector<2x16x64xf32>
    %cst_51 = arith.constant dense<0.000000e+00> : vector<2x64xf32>
    %82 = vector.multi_reduction <add>, %81, %cst_51 [1] : vector<2x16x64xf32> to vector<2x64xf32>
    %c0_52 = arith.constant 0 : index
    %c0_53 = arith.constant 0 : index
    %83 = vector.load %arg8[%c0_52, %c0_53] : memref<64x4xf32, #tpu.memory_space<vmem>>, vector<64x4xf32>
    %cst_54 = arith.constant dense<0.000000e+00> : vector<2x4xf32>
    %84 = tpu.matmul %82, %83, %cst_54 {dimension_numbers = #tpu.dot_dimension_numbers<[1], [0], [0], [1], [0, 0, 1, 1], [], []>} : vector<2x64xf32>, vector<64x4xf32>, vector<2x4xf32> -> vector<2x4xf32>
    %85 = arith.mulf %81, %81 : vector<2x16x64xf32>
    %cst_55 = arith.constant dense<0.000000e+00> : vector<2x64xf32>
    %86 = vector.multi_reduction <add>, %85, %cst_55 [1] : vector<2x16x64xf32> to vector<2x64xf32>
    %c0_56 = arith.constant 0 : index
    %c0_57 = arith.constant 0 : index
    %87 = vector.load %arg8[%c0_56, %c0_57] : memref<64x4xf32, #tpu.memory_space<vmem>>, vector<64x4xf32>
    %cst_58 = arith.constant dense<0.000000e+00> : vector<2x4xf32>
    %88 = tpu.matmul %86, %87, %cst_58 {dimension_numbers = #tpu.dot_dimension_numbers<[1], [0], [0], [1], [0, 0, 1, 1], [], []>} : vector<2x64xf32>, vector<64x4xf32>, vector<2x4xf32> -> vector<2x4xf32>
    %cst_59 = arith.constant 3.906250e-03 : f32
    %89 = vector.broadcast %cst_59 : f32 to vector<2x4xf32>
    %90 = arith.mulf %84, %89 : vector<2x4xf32>
    %cst_60 = arith.constant 3.906250e-03 : f32
    %91 = vector.broadcast %cst_60 : f32 to vector<2x4xf32>
    %92 = arith.mulf %88, %91 : vector<2x4xf32>
    %93 = arith.mulf %90, %90 : vector<2x4xf32>
    %94 = arith.subf %92, %93 : vector<2x4xf32>
    %cst_61 = arith.constant 9.99999974E-6 : f32
    %95 = vector.broadcast %cst_61 : f32 to vector<2x4xf32>
    %96 = arith.addf %94, %95 : vector<2x4xf32>
    %97 = math.rsqrt %96 : vector<2x4xf32>
    %c0_62 = arith.constant 0 : index
    %c0_63 = arith.constant 0 : index
    %98 = vector.load %arg6[%c0_62, %c0_63] : memref<1x4xf32, #tpu.memory_space<vmem>>, vector<1x4xf32>
    %99 = vector.broadcast %98 : vector<1x4xf32> to vector<2x4xf32>
    %100 = arith.mulf %97, %99 : vector<2x4xf32>
    %c0_64 = arith.constant 0 : index
    %c0_65 = arith.constant 0 : index
    %101 = vector.load %arg7[%c0_64, %c0_65] : memref<1x4xf32, #tpu.memory_space<vmem>>, vector<1x4xf32>
    %102 = arith.mulf %90, %100 : vector<2x4xf32>
    %103 = vector.broadcast %101 : vector<1x4xf32> to vector<2x4xf32>
    %104 = arith.subf %103, %102 : vector<2x4xf32>
    %c0_66 = arith.constant 0 : index
    %c0_67 = arith.constant 0 : index
    %105 = vector.load %arg9[%c0_66, %c0_67] : memref<4x64xf32, #tpu.memory_space<vmem>>, vector<4x64xf32>
    %cst_68 = arith.constant dense<0.000000e+00> : vector<2x64xf32>
    %106 = tpu.matmul %100, %105, %cst_68 {dimension_numbers = #tpu.dot_dimension_numbers<[1], [0], [0], [1], [0, 0, 1, 1], [], []>} : vector<2x4xf32>, vector<4x64xf32>, vector<2x64xf32> -> vector<2x64xf32>
    %c0_69 = arith.constant 0 : index
    %c0_70 = arith.constant 0 : index
    %107 = vector.load %arg9[%c0_69, %c0_70] : memref<4x64xf32, #tpu.memory_space<vmem>>, vector<4x64xf32>
    %cst_71 = arith.constant dense<0.000000e+00> : vector<2x64xf32>
    %108 = tpu.matmul %104, %107, %cst_71 {dimension_numbers = #tpu.dot_dimension_numbers<[1], [0], [0], [1], [0, 0, 1, 1], [], []>} : vector<2x4xf32>, vector<4x64xf32>, vector<2x64xf32> -> vector<2x64xf32>
    %109 = vector.shape_cast %106 : vector<2x64xf32> to vector<2x1x64xf32>
    %110 = vector.broadcast %109 : vector<2x1x64xf32> to vector<2x16x64xf32>
    %111 = arith.mulf %81, %110 : vector<2x16x64xf32>
    %112 = vector.shape_cast %108 : vector<2x64xf32> to vector<2x1x64xf32>
    %113 = vector.broadcast %112 : vector<2x1x64xf32> to vector<2x16x64xf32>
    %114 = arith.addf %111, %113 : vector<2x16x64xf32>
    %115 = arith.addf %114, %0 : vector<2x16x64xf32>
    %c0_72 = arith.constant 0 : index
    %c0_73 = arith.constant 0 : index
    %c0_74 = arith.constant 0 : index
    %116 = vector.load %arg10[%c0_72, %c0_73, %c0_74] : memref<2x16x64xf32, #tpu.memory_space<vmem>>, vector<2x16x64xf32>
    tpu.vector_store %arg10[%c0_72, %c0_73, %c0_74], %115 {strides = array<i32>} : memref<2x16x64xf32, #tpu.memory_space<vmem>>, vector<2x16x64xf32>,
    return
  }
  func.func @transform_0(%arg0: i32) -> (i32, i32, i32) {
    %c0_i32 = arith.constant 0 : i32
    %c0_i32_0 = arith.constant 0 : i32
    %c0_i32_1 = arith.constant 0 : i32
    return %arg0, %c0_i32, %c0_i32_0 : i32, i32, i32
  }
  func.func @transform_1(%arg0: i32) -> (i32, i32, i32) {
    %c0_i32 = arith.constant 0 : i32
    %c0_i32_0 = arith.constant 0 : i32
    %c0_i32_1 = arith.constant 0 : i32
    %c0_i32_2 = arith.constant 0 : i32
    return %c0_i32, %c0_i32_0, %c0_i32_1 : i32, i32, i32
  }
  func.func @transform_2(%arg0: i32) -> (i32, i32) {
    %c0_i32 = arith.constant 0 : i32
    %c0_i32_0 = arith.constant 0 : i32
    %c0_i32_1 = arith.constant 0 : i32
    return %c0_i32, %c0_i32_0 : i32, i32
  }
  func.func @transform_3(%arg0: i32) -> (i32, i32) {
    %c0_i32 = arith.constant 0 : i32
    %c0_i32_0 = arith.constant 0 : i32
    %c0_i32_1 = arith.constant 0 : i32
    return %c0_i32, %c0_i32_0 : i32, i32
  }
  func.func @transform_4(%arg0: i32) -> (i32, i32, i32) {
    %c0_i32 = arith.constant 0 : i32
    %c0_i32_0 = arith.constant 0 : i32
    %c0_i32_1 = arith.constant 0 : i32
    %c0_i32_2 = arith.constant 0 : i32
    return %c0_i32, %c0_i32_0, %c0_i32_1 : i32, i32, i32
  }
  func.func @transform_5(%arg0: i32) -> (i32, i32) {
    %c0_i32 = arith.constant 0 : i32
    %c0_i32_0 = arith.constant 0 : i32
    %c0_i32_1 = arith.constant 0 : i32
    return %c0_i32, %c0_i32_0 : i32, i32
  }
  func.func @transform_6(%arg0: i32) -> (i32, i32) {
    %c0_i32 = arith.constant 0 : i32
    %c0_i32_0 = arith.constant 0 : i32
    %c0_i32_1 = arith.constant 0 : i32
    return %c0_i32, %c0_i32_0 : i32, i32
  }
  func.func @transform_7(%arg0: i32) -> (i32, i32) {
    %c0_i32 = arith.constant 0 : i32
    %c0_i32_0 = arith.constant 0 : i32
    %c0_i32_1 = arith.constant 0 : i32
    return %c0_i32, %c0_i32_0 : i32, i32
  }
  func.func @transform_8(%arg0: i32) -> (i32, i32) {
    %c0_i32 = arith.constant 0 : i32
    %c0_i32_0 = arith.constant 0 : i32
    %c0_i32_1 = arith.constant 0 : i32
    return %c0_i32, %c0_i32_0 : i32, i32
  }
  func.func @transform_9(%arg0: i32) -> (i32, i32, i32) {
    %c0_i32 = arith.constant 0 : i32
    %c0_i32_0 = arith.constant 0 : i32
    %c0_i32_1 = arith.constant 0 : i32
    return %arg0, %c0_i32, %c0_i32_0 : i32, i32, i32
  }
}

module attributes {stable_mosaic.version = 11 : i64} {
  func.func @_resblock_small_kernel(%arg0: i32, %arg1: memref<2x16x64xf32, #tpu.memory_space<vmem>>, %arg2: memref<3x64x64xf32, #tpu.memory_space<vmem>>, %arg3: memref<1x4xf32, #tpu.memory_space<vmem>>, %arg4: memref<1x4xf32, #tpu.memory_space<vmem>>, %arg5: memref<3x64x64xf32, #tpu.memory_space<vmem>>, %arg6: memref<1x4xf32, #tpu.memory_space<vmem>>, %arg7: memref<1x4xf32, #tpu.memory_space<vmem>>, %arg8: memref<64x4xf32, #tpu.memory_space<vmem>>, %arg9: memref<4x64xf32, #tpu.memory_space<vmem>>, %arg10: memref<2x16x64xf32, #tpu.memory_space<vmem>>) attributes {dimension_semantics = [#tpu.dimension_semantics<parallel>], iteration_bounds = array<i64: 1>, scalar_prefetch = 0 : i64, scratch_operands = 0 : i64, tpu.core_type = #tpu.core_type<tc>, window_params = [{transform_indices = @transform_0, window_bounds = array<i64: 2, 16, 64>}, {pipeline_mode = #tpu.pipeline_mode<synchronous>, transform_indices = @transform_1, window_bounds = array<i64: 3, 64, 64>}, {pipeline_mode = #tpu.pipeline_mode<synchronous>, transform_indices = @transform_2, window_bounds = array<i64: 1, 4>}, {pipeline_mode = #tpu.pipeline_mode<synchronous>, transform_indices = @transform_3, window_bounds = array<i64: 1, 4>}, {pipeline_mode = #tpu.pipeline_mode<synchronous>, transform_indices = @transform_4, window_bounds = array<i64: 3, 64, 64>}, {pipeline_mode = #tpu.pipeline_mode<synchronous>, transform_indices = @transform_5, window_bounds = array<i64: 1, 4>}, {pipeline_mode = #tpu.pipeline_mode<synchronous>, transform_indices = @transform_6, window_bounds = array<i64: 1, 4>}, {pipeline_mode = #tpu.pipeline_mode<synchronous>, transform_indices = @transform_7, window_bounds = array<i64: 64, 4>}, {pipeline_mode = #tpu.pipeline_mode<synchronous>, transform_indices = @transform_8, window_bounds = array<i64: 4, 64>}, {transform_indices = @transform_9, window_bounds = array<i64: 2, 16, 64>}]} {
    %c0 = arith.constant 0 : index
    %c0_0 = arith.constant 0 : index
    %c0_1 = arith.constant 0 : index
    %0 = vector.load %arg1[%c0, %c0_0, %c0_1] : memref<2x16x64xf32, #tpu.memory_space<vmem>>, vector<2x16x64xf32>
    %cst = arith.constant 0.000000e+00 : f32
    %1 = vector.broadcast %cst : f32 to vector<2x1x64xf32>
    %2 = vector.extract_strided_slice %0 {offsets = [0, 0, 0], sizes = [2, 15, 64], strides = [1, 1, 1]} : vector<2x16x64xf32> to vector<2x15x64xf32>
    %3 = tpu.concatenate %1, %2 in 1 : vector<2x1x64xf32>, vector<2x15x64xf32> -> vector<2x16x64xf32>
    %cst_2 = arith.constant 0.000000e+00 : f32
    %4 = vector.broadcast %cst_2 : f32 to vector<2x1x64xf32>
    %5 = vector.extract_strided_slice %0 {offsets = [0, 1, 0], sizes = [2, 15, 64], strides = [1, 1, 1]} : vector<2x16x64xf32> to vector<2x15x64xf32>
    %6 = tpu.concatenate %5, %4 in 1 : vector<2x15x64xf32>, vector<2x1x64xf32> -> vector<2x16x64xf32>
    %cst_3 = arith.constant 0.000000e+00 : f32
    %7 = vector.broadcast %cst_3 : f32 to vector<32x64xf32>
    %8 = vector.shape_cast %3 : vector<2x16x64xf32> to vector<32x64xf32>
    %c0_4 = arith.constant 0 : index
    %c0_5 = arith.constant 0 : index
    %c0_6 = arith.constant 0 : index
    %9 = vector.load %arg2[%c0_4, %c0_5, %c0_6] : memref<3x64x64xf32, #tpu.memory_space<vmem>>, vector<1x64x64xf32>
    %10 = vector.shape_cast %9 : vector<1x64x64xf32> to vector<64x64xf32>
    %cst_7 = arith.constant dense<0.000000e+00> : vector<32x64xf32>
    %11 = tpu.matmul %8, %10, %cst_7 {dimension_numbers = #tpu.dot_dimension_numbers<[1], [0], [0], [1], [0, 0, 1, 1], [], []>} : vector<32x64xf32>, vector<64x64xf32>, vector<32x64xf32> -> vector<32x64xf32>
    %12 = arith.addf %7, %11 : vector<32x64xf32>
    %13 = vector.shape_cast %0 : vector<2x16x64xf32> to vector<32x64xf32>
    %c1 = arith.constant 1 : index
    %c0_8 = arith.constant 0 : index
    %c0_9 = arith.constant 0 : index
    %14 = vector.load %arg2[%c1, %c0_8, %c0_9] : memref<3x64x64xf32, #tpu.memory_space<vmem>>, vector<1x64x64xf32>
    %15 = vector.shape_cast %14 : vector<1x64x64xf32> to vector<64x64xf32>
    %cst_10 = arith.constant dense<0.000000e+00> : vector<32x64xf32>
    %16 = tpu.matmul %13, %15, %cst_10 {dimension_numbers = #tpu.dot_dimension_numbers<[1], [0], [0], [1], [0, 0, 1, 1], [], []>} : vector<32x64xf32>, vector<64x64xf32>, vector<32x64xf32> -> vector<32x64xf32>
    %17 = arith.addf %12, %16 : vector<32x64xf32>
    %18 = vector.shape_cast %6 : vector<2x16x64xf32> to vector<32x64xf32>
    %c2 = arith.constant 2 : index
    %c0_11 = arith.constant 0 : index
    %c0_12 = arith.constant 0 : index
    %19 = vector.load %arg2[%c2, %c0_11, %c0_12] : memref<3x64x64xf32, #tpu.memory_space<vmem>>, vector<1x64x64xf32>
    %20 = vector.shape_cast %19 : vector<1x64x64xf32> to vector<64x64xf32>
    %cst_13 = arith.constant dense<0.000000e+00> : vector<32x64xf32>
    %21 = tpu.matmul %18, %20, %cst_13 {dimension_numbers = #tpu.dot_dimension_numbers<[1], [0], [0], [1], [0, 0, 1, 1], [], []>} : vector<32x64xf32>, vector<64x64xf32>, vector<32x64xf32> -> vector<32x64xf32>
    %22 = arith.addf %17, %21 : vector<32x64xf32>
    %23 = vector.shape_cast %22 : vector<32x64xf32> to vector<2x16x64xf32>
    %cst_14 = arith.constant dense<0.000000e+00> : vector<2x64xf32>
    %24 = vector.multi_reduction <add>, %23, %cst_14 [1] : vector<2x16x64xf32> to vector<2x64xf32>
    %c0_15 = arith.constant 0 : index
    %c0_16 = arith.constant 0 : index
    %25 = vector.load %arg8[%c0_15, %c0_16] : memref<64x4xf32, #tpu.memory_space<vmem>>, vector<64x4xf32>
    %cst_17 = arith.constant dense<0.000000e+00> : vector<2x4xf32>
    %26 = tpu.matmul %24, %25, %cst_17 {dimension_numbers = #tpu.dot_dimension_numbers<[1], [0], [0], [1], [0, 0, 1, 1], [], []>} : vector<2x64xf32>, vector<64x4xf32>, vector<2x4xf32> -> vector<2x4xf32>
    %27 = arith.mulf %23, %23 : vector<2x16x64xf32>
    %cst_18 = arith.constant dense<0.000000e+00> : vector<2x64xf32>
    %28 = vector.multi_reduction <add>, %27, %cst_18 [1] : vector<2x16x64xf32> to vector<2x64xf32>
    %c0_19 = arith.constant 0 : index
    %c0_20 = arith.constant 0 : index
    %29 = vector.load %arg8[%c0_19, %c0_20] : memref<64x4xf32, #tpu.memory_space<vmem>>, vector<64x4xf32>
    %cst_21 = arith.constant dense<0.000000e+00> : vector<2x4xf32>
    %30 = tpu.matmul %28, %29, %cst_21 {dimension_numbers = #tpu.dot_dimension_numbers<[1], [0], [0], [1], [0, 0, 1, 1], [], []>} : vector<2x64xf32>, vector<64x4xf32>, vector<2x4xf32> -> vector<2x4xf32>
    %cst_22 = arith.constant 3.906250e-03 : f32
    %31 = vector.broadcast %cst_22 : f32 to vector<2x4xf32>
    %32 = arith.mulf %26, %31 : vector<2x4xf32>
    %cst_23 = arith.constant 3.906250e-03 : f32
    %33 = vector.broadcast %cst_23 : f32 to vector<2x4xf32>
    %34 = arith.mulf %30, %33 : vector<2x4xf32>
    %35 = arith.mulf %32, %32 : vector<2x4xf32>
    %36 = arith.subf %34, %35 : vector<2x4xf32>
    %cst_24 = arith.constant 9.99999974E-6 : f32
    %37 = vector.broadcast %cst_24 : f32 to vector<2x4xf32>
    %38 = arith.addf %36, %37 : vector<2x4xf32>
    %39 = math.rsqrt %38 : vector<2x4xf32>
    %c0_25 = arith.constant 0 : index
    %c0_26 = arith.constant 0 : index
    %40 = vector.load %arg3[%c0_25, %c0_26] : memref<1x4xf32, #tpu.memory_space<vmem>>, vector<1x4xf32>
    %41 = vector.broadcast %40 : vector<1x4xf32> to vector<2x4xf32>
    %42 = arith.mulf %39, %41 : vector<2x4xf32>
    %c0_27 = arith.constant 0 : index
    %c0_28 = arith.constant 0 : index
    %43 = vector.load %arg4[%c0_27, %c0_28] : memref<1x4xf32, #tpu.memory_space<vmem>>, vector<1x4xf32>
    %44 = arith.mulf %32, %42 : vector<2x4xf32>
    %45 = vector.broadcast %43 : vector<1x4xf32> to vector<2x4xf32>
    %46 = arith.subf %45, %44 : vector<2x4xf32>
    %c0_29 = arith.constant 0 : index
    %c0_30 = arith.constant 0 : index
    %47 = vector.load %arg9[%c0_29, %c0_30] : memref<4x64xf32, #tpu.memory_space<vmem>>, vector<4x64xf32>
    %cst_31 = arith.constant dense<0.000000e+00> : vector<2x64xf32>
    %48 = tpu.matmul %42, %47, %cst_31 {dimension_numbers = #tpu.dot_dimension_numbers<[1], [0], [0], [1], [0, 0, 1, 1], [], []>} : vector<2x4xf32>, vector<4x64xf32>, vector<2x64xf32> -> vector<2x64xf32>
    %c0_32 = arith.constant 0 : index
    %c0_33 = arith.constant 0 : index
    %49 = vector.load %arg9[%c0_32, %c0_33] : memref<4x64xf32, #tpu.memory_space<vmem>>, vector<4x64xf32>
    %cst_34 = arith.constant dense<0.000000e+00> : vector<2x64xf32>
    %50 = tpu.matmul %46, %49, %cst_34 {dimension_numbers = #tpu.dot_dimension_numbers<[1], [0], [0], [1], [0, 0, 1, 1], [], []>} : vector<2x4xf32>, vector<4x64xf32>, vector<2x64xf32> -> vector<2x64xf32>
    %51 = vector.shape_cast %48 : vector<2x64xf32> to vector<2x1x64xf32>
    %52 = vector.broadcast %51 : vector<2x1x64xf32> to vector<2x16x64xf32>
    %53 = arith.mulf %23, %52 : vector<2x16x64xf32>
    %54 = vector.shape_cast %50 : vector<2x64xf32> to vector<2x1x64xf32>
    %55 = vector.broadcast %54 : vector<2x1x64xf32> to vector<2x16x64xf32>
    %56 = arith.addf %53, %55 : vector<2x16x64xf32>
    %cst_35 = arith.constant 0.000000e+00 : f32
    %57 = vector.broadcast %cst_35 : f32 to vector<2x16x64xf32>
    %58 = arith.maximumf %56, %57 : vector<2x16x64xf32>
    %cst_36 = arith.constant 0.000000e+00 : f32
    %59 = vector.broadcast %cst_36 : f32 to vector<2x1x64xf32>
    %60 = vector.extract_strided_slice %58 {offsets = [0, 0, 0], sizes = [2, 15, 64], strides = [1, 1, 1]} : vector<2x16x64xf32> to vector<2x15x64xf32>
    %61 = tpu.concatenate %59, %60 in 1 : vector<2x1x64xf32>, vector<2x15x64xf32> -> vector<2x16x64xf32>
    %cst_37 = arith.constant 0.000000e+00 : f32
    %62 = vector.broadcast %cst_37 : f32 to vector<2x1x64xf32>
    %63 = vector.extract_strided_slice %58 {offsets = [0, 1, 0], sizes = [2, 15, 64], strides = [1, 1, 1]} : vector<2x16x64xf32> to vector<2x15x64xf32>
    %64 = tpu.concatenate %63, %62 in 1 : vector<2x15x64xf32>, vector<2x1x64xf32> -> vector<2x16x64xf32>
    %cst_38 = arith.constant 0.000000e+00 : f32
    %65 = vector.broadcast %cst_38 : f32 to vector<32x64xf32>
    %66 = vector.shape_cast %61 : vector<2x16x64xf32> to vector<32x64xf32>
    %c0_39 = arith.constant 0 : index
    %c0_40 = arith.constant 0 : index
    %c0_41 = arith.constant 0 : index
    %67 = vector.load %arg5[%c0_39, %c0_40, %c0_41] : memref<3x64x64xf32, #tpu.memory_space<vmem>>, vector<1x64x64xf32>
    %68 = vector.shape_cast %67 : vector<1x64x64xf32> to vector<64x64xf32>
    %cst_42 = arith.constant dense<0.000000e+00> : vector<32x64xf32>
    %69 = tpu.matmul %66, %68, %cst_42 {dimension_numbers = #tpu.dot_dimension_numbers<[1], [0], [0], [1], [0, 0, 1, 1], [], []>} : vector<32x64xf32>, vector<64x64xf32>, vector<32x64xf32> -> vector<32x64xf32>
    %70 = arith.addf %65, %69 : vector<32x64xf32>
    %71 = vector.shape_cast %58 : vector<2x16x64xf32> to vector<32x64xf32>
    %c1_43 = arith.constant 1 : index
    %c0_44 = arith.constant 0 : index
    %c0_45 = arith.constant 0 : index
    %72 = vector.load %arg5[%c1_43, %c0_44, %c0_45] : memref<3x64x64xf32, #tpu.memory_space<vmem>>, vector<1x64x64xf32>
    %73 = vector.shape_cast %72 : vector<1x64x64xf32> to vector<64x64xf32>
    %cst_46 = arith.constant dense<0.000000e+00> : vector<32x64xf32>
    %74 = tpu.matmul %71, %73, %cst_46 {dimension_numbers = #tpu.dot_dimension_numbers<[1], [0], [0], [1], [0, 0, 1, 1], [], []>} : vector<32x64xf32>, vector<64x64xf32>, vector<32x64xf32> -> vector<32x64xf32>
    %75 = arith.addf %70, %74 : vector<32x64xf32>
    %76 = vector.shape_cast %64 : vector<2x16x64xf32> to vector<32x64xf32>
    %c2_47 = arith.constant 2 : index
    %c0_48 = arith.constant 0 : index
    %c0_49 = arith.constant 0 : index
    %77 = vector.load %arg5[%c2_47, %c0_48, %c0_49] : memref<3x64x64xf32, #tpu.memory_space<vmem>>, vector<1x64x64xf32>
    %78 = vector.shape_cast %77 : vector<1x64x64xf32> to vector<64x64xf32>
    %cst_50 = arith.constant dense<0.000000e+00> : vector<32x64xf32>
    %79 = tpu.matmul %76, %78, %cst_50 {dimension_numbers = #tpu.dot_dimension_numbers<[1], [0], [0], [1], [0, 0, 1, 1], [], []>} : vector<32x64xf32>, vector<64x64xf32>, vector<32x64xf32> -> vector<32x64xf32>
    %80 = arith.addf %75, %79 : vector<32x64xf32>
    %81 = vector.shape_cast %80 : vector<32x64xf32> to vector<2x16x64xf32>
    %cst_51 = arith.constant dense<0.000000e+00> : vector<2x64xf32>
    %82 = vector.multi_reduction <add>, %81, %cst_51 [1] : vector<2x16x64xf32> to vector<2x64xf32>
    %c0_52 = arith.constant 0 : index
    %c0_53 = arith.constant 0 : index
    %83 = vector.load %arg8[%c0_52, %c0_53] : memref<64x4xf32, #tpu.memory_space<vmem>>, vector<64x4xf32>
    %cst_54 = arith.constant dense<0.000000e+00> : vector<2x4xf32>
    %84 = tpu.matmul %82, %83, %cst_54 {dimension_numbers = #tpu.dot_dimension_numbers<[1], [0], [0], [1], [0, 0, 1, 1], [], []>} : vector<2x64xf32>, vector<64x4xf32>, vector<2x4xf32> -> vector<2x4xf32>
    %85 = arith.mulf %81, %81 : vector<2x16x64xf32>
    %cst_55 = arith.constant dense<0.000000e+00> : vector<2x64xf32>
    %86 = vector.multi_reduction <add>, %85, %cst_55 [1] : vector<2x16x64xf32> to vector<2x64xf32>
    %c0_56 = arith.constant 0 : index
    %c0_57 = arith.constant 0 : index
    %87 = vector.load %arg8[%c0_56, %c0_57] : memref<64x4xf32, #tpu.memory_space<vmem>>, vector<64x4xf32>
    %cst_58 = arith.constant dense<0.000000e+00> : vector<2x4xf32>
    %88 = tpu.matmul %86, %87, %cst_58 {dimension_numbers = #tpu.dot_dimension_numbers<[1], [0], [0], [1], [0, 0, 1, 1], [], []>} : vector<2x64xf32>, vector<64x4xf32>, vector<2x4xf32> -> vector<2x4xf32>
    %cst_59 = arith.constant 3.906250e-03 : f32
    %89 = vector.broadcast %cst_59 : f32 to vector<2x4xf32>
    %90 = arith.mulf %84, %89 : vector<2x4xf32>
    %cst_60 = arith.constant 3.906250e-03 : f32
    %91 = vector.broadcast %cst_60 : f32 to vector<2x4xf32>
    %92 = arith.mulf %88, %91 : vector<2x4xf32>
    %93 = arith.mulf %90, %90 : vector<2x4xf32>
    %94 = arith.subf %92, %93 : vector<2x4xf32>
    %cst_61 = arith.constant 9.99999974E-6 : f32
    %95 = vector.broadcast %cst_61 : f32 to vector<2x4xf32>
    %96 = arith.addf %94, %95 : vector<2x4xf32>
    %97 = math.rsqrt %96 : vector<2x4xf32>
    %c0_62 = arith.constant 0 : index
    %c0_63 = arith.constant 0 : index
    %98 = vector.load %arg6[%c0_62, %c0_63] : memref<1x4xf32, #tpu.memory_space<vmem>>, vector<1x4xf32>
    %99 = vector.broadcast %98 : vector<1x4xf32> to vector<2x4xf32>
    %100 = arith.mulf %97, %99 : vector<2x4xf32>
    %c0_64 = arith.constant 0 : index
    %c0_65 = arith.constant 0 : index
    %101 = vector.load %arg7[%c0_64, %c0_65] : memref<1x4xf32, #tpu.memory_space<vmem>>, vector<1x4xf32>
    %102 = arith.mulf %90, %100 : vector<2x4xf32>
    %103 = vector.broadcast %101 : vector<1x4xf32> to vector<2x4xf32>
    %104 = arith.subf %103, %102 : vector<2x4xf32>
    %c0_66 = arith.constant 0 : index
    %c0_67 = arith.constant 0 : index
    %105 = vector.load %arg9[%c0_66, %c0_67] : memref<4x64xf32, #tpu.memory_space<vmem>>, vector<4x64xf32>
    %cst_68 = arith.constant dense<0.000000e+00> : vector<2x64xf32>
    %106 = tpu.matmul %100, %105, %cst_68 {dimension_numbers = #tpu.dot_dimension_numbers<[1], [0], [0], [1], [0, 0, 1, 1], [], []>} : vector<2x4xf32>, vector<4x64xf32>, vector<2x64xf32> -> vector<2x64xf32>
    %c0_69 = arith.constant 0 : index
    %c0_70 = arith.constant 0 : index
    %107 = vector.load %arg9[%c0_69, %c0_70] : memref<4x64xf32, #tpu.memory_space<vmem>>, vector<4x64xf32>
    %cst_71 = arith.constant dense<0.000000e+00> : vector<2x64xf32>
    %108 = tpu.matmul %104, %107, %cst_71 {dimension_numbers = #tpu.dot_dimension_numbers<[1], [0], [0], [1], [0, 0, 1, 1], [], []>} : vector<2x4xf32>, vector<4x64xf32>, vector<2x64xf32> -> vector<2x64xf32>
    %109 = vector.shape_cast %106 : vector<2x64xf32> to vector<2x1x64xf32>
    %110 = vector.broadcast %109 : vector<2x1x64xf32> to vector<2x16x64xf32>
    %111 = arith.mulf %81, %110 : vector<2x16x64xf32>
    %112 = vector.shape_cast %108 : vector<2x64xf32> to vector<2x1x64xf32>
    %113 = vector.broadcast %112 : vector<2x1x64xf32> to vector<2x16x64xf32>
    %114 = arith.addf %111, %113 : vector<2x16x64xf32>
    %115 = arith.addf %114, %0 : vector<2x16x64xf32>
    %c0_72 = arith.constant 0 : index
    %c0_73 = arith.constant 0 : index
    %c0_74 = arith.constant 0 : index
    %116 = vector.load %arg10[%c0_72, %c0_73, %c0_74] : memref<2x16x64xf32, #tpu.memory_space<vmem>>, vector<2x16x64xf32>
    tpu.vector_store %arg10[%c0_72, %c0_73, %c0_74], %115 {strides = array<i32>} : memref<2x16x64xf32, #tpu.memory_space<vmem>>, vector<2x16x64xf32>,
    return
  }
  func.func @transform_0(%arg0: i32) -> (i32, i32, i32) {
    %c0_i32 = arith.constant 0 : i32
    %c0_i32_0 = arith.constant 0 : i32
    %c0_i32_1 = arith.constant 0 : i32
    return %arg0, %c0_i32, %c0_i32_0 : i32, i32, i32
  }
  func.func @transform_1(%arg0: i32) -> (i32, i32, i32) {
    %c0_i32 = arith.constant 0 : i32
    %c0_i32_0 = arith.constant 0 : i32
    %c0_i32_1 = arith.constant 0 : i32
    %c0_i32_2 = arith.constant 0 : i32
    return %c0_i32, %c0_i32_0, %c0_i32_1 : i32, i32, i32
  }
  func.func @transform_2(%arg0: i32) -> (i32, i32) {
    %c0_i32 = arith.constant 0 : i32
    %c0_i32_0 = arith.constant 0 : i32
    %c0_i32_1 = arith.constant 0 : i32
    return %c0_i32, %c0_i32_0 : i32, i32
  }
  func.func @transform_3(%arg0: i32) -> (i32, i32) {
    %c0_i32 = arith.constant 0 : i32
    %c0_i32_0 = arith.constant 0 : i32
    %c0_i32_1 = arith.constant 0 : i32
    return %c0_i32, %c0_i32_0 : i32, i32
  }
  func.func @transform_4(%arg0: i32) -> (i32, i32, i32) {
    %c0_i32 = arith.constant 0 : i32
    %c0_i32_0 = arith.constant 0 : i32
    %c0_i32_1 = arith.constant 0 : i32
    %c0_i32_2 = arith.constant 0 : i32
    return %c0_i32, %c0_i32_0, %c0_i32_1 : i32, i32, i32
  }
  func.func @transform_5(%arg0: i32) -> (i32, i32) {
    %c0_i32 = arith.constant 0 : i32
    %c0_i32_0 = arith.constant 0 : i32
    %c0_i32_1 = arith.constant 0 : i32
    return %c0_i32, %c0_i32_0 : i32, i32
  }
  func.func @transform_6(%arg0: i32) -> (i32, i32) {
    %c0_i32 = arith.constant 0 : i32
    %c0_i32_0 = arith.constant 0 : i32
    %c0_i32_1 = arith.constant 0 : i32
    return %c0_i32, %c0_i32_0 : i32, i32
  }
  func.func @transform_7(%arg0: i32) -> (i32, i32) {
    %c0_i32 = arith.constant 0 : i32
    %c0_i32_0 = arith.constant 0 : i32
    %c0_i32_1 = arith.constant 0 : i32
    return %c0_i32, %c0_i32_0 : i32, i32
  }
  func.func @transform_8(%arg0: i32) -> (i32, i32) {
    %c0_i32 = arith.constant 0 : i32
    %c0_i32_0 = arith.constant 0 : i32
    %c0_i32_1 = arith.constant 0 : i32
    return %c0_i32, %c0_i32_0 : i32, i32
  }
  func.func @transform_9(%arg0: i32) -> (i32, i32, i32) {
    %c0_i32 = arith.constant 0 : i32
    %c0_i32_0 = arith.constant 0 : i32
    %c0_i32_1 = arith.constant 0 : i32
    return %arg0, %c0_i32, %c0_i32_0 : i32, i32, i32
  }
}

</mosaic_0001>

<bundles_post_ra>
// kernel: tpu_custom_call.1
= control target key start
LH: loop header
LB: loop body
LE: loop exit
PB: predicated region body
PF: predicated region fallthrough
CT: control target
= control target key end

     0   :  { %14 = vsyncpa [#allocation3], 0  ;;  %s2990_s0 = inlined_call_operand.hbm [shape: f32[2,16,64], index: 0, kind: input, shape index: {}]   ;;  %s2991_s1 = inlined_call_operand.hbm [shape: f32[3,64,64], index: 1, kind: input, shape index: {}]   ;;  %s2992_s2 = inlined_call_operand.hbm [shape: f32[1,4], index: 2, kind: input, shape index: {}]   ;;  %s2993_s3 = inlined_call_operand.hbm [shape: f32[1,4], index: 3, kind: input, shape index: {}]   ;;  %s2994_s4 = inlined_call_operand.hbm [shape: f32[3,64,64], index: 4, kind: input, shape index: {}]   ;;  %s2995_s5 = inlined_call_operand.hbm [shape: f32[1,4], index: 5, kind: input, shape index: {}]   ;;  %s2996_s6 = inlined_call_operand.hbm [shape: f32[1,4], index: 6, kind: input, shape index: {}]   ;;  %s2997_s7 = inlined_call_operand.hbm [shape: f32[64,4], index: 7, kind: input, shape index: {}]   ;;  %s2998_s8 = inlined_call_operand.hbm [shape: f32[4,64], index: 8, kind: input, shape index: {}]   ;;  %s2999_s9 = inlined_call_operand.hbm [shape: f32[2,16,64], index: 9, kind: output, shape index: {}]  }
   0x1   :  { %15 = vsyncpa [#allocation6], 0 }
   0x2   :  { %16 = vsyncpa [#allocation9], 0 }
   0x3   :  { %17 = vsyncpa [#allocation12], 0 }
   0x4   :  { %18 = vsyncpa [#allocation15], 0 }
   0x5   :  { %19 = vsyncpa [#allocation4], 0  ;;  %s2536_s30 = smov [#allocation5]   ;;  %s2537_s11 = smov [#allocation8]  }
   0x6   :  { %s37_s10 = sshll.u32 %s2536_s30, 4  ;;  %s60_s12 = sshll.u32 %s2537_s11, 4  ;;  %s38_s10 = int_to_ptr.vmem [resolvable:$true] %s37_s10  ;;  %s2602_s12 = int_to_ptr.vmem [resolvable:$true] %s60_s12 }
   0x7   :  { %s2304_s15 = scalar_lea.hbm %s2991_s1, 3072 }
   0x8   :  { %p2305_p0 = scmp.ne.s32.totalorder %s2991_s1, %s2304_s15  ;;  %p2308_p1 = scmp.lt.u32.totalorder %s2304_s15, %s2991_s1 }
   0xa   :  { %p2310_p2 = pnand %p2308_p1, %p2305_p0 }
   0xc   :  { %2313 = shalt.err (!%p2310_p2)
}
   0xd   :  { %s2314_s20 = scalar_lea.vmem %s38_s10, 3072  ;;  %p2319_p4 = scmp.lt.s32.totalorder %s38_s10, %s38_s10 }
   0xe   :  { %p2315_p3 = scmp.ne.s32.totalorder %s38_s10, %s2314_s20  ;;  %p2320_p5 = scmp.lt.s32.totalorder %s2314_s20, %s2314_s20 }
  0x10   :  { %p2321_p6 = por %p2320_p5, %p2319_p4 }
  0x12   :  { %p2322_p7 = pnand %p2321_p6, %p2315_p3 }
  0x14   :  { %2325 = shalt.err (!%p2322_p7)
}
  0x15   :  { %s2538_s21 = smov 128   ;;  %s2539_s22 = smov 8  }
  0x16   :  { %43 = dma.hbm_to_vmem [thread:$0]  %s2991_s1, 3072, %s38_s10, [#allocation6], %s2538_s21, %s2538_s21, %s2539_s22  }
  0x17   :  { %s2326_s27 = scalar_lea.hbm %s2993_s3, 16 }
  0x18   :  { %p2327_p8 = scmp.ne.s32.totalorder %s2993_s3, %s2326_s27  ;;  %p2330_p9 = scmp.lt.u32.totalorder %s2326_s27, %s2993_s3 }
  0x1a   :  { %p2332_p10 = pnand %p2330_p9, %p2327_p8 }
  0x1c   :  { %2335 = shalt.err (!%p2332_p10)
}
  0x1d   :  { %s2336_s13 = scalar_lea.vmem %s2602_s12, 16  ;;  %s2340_s1 = scalar_lea.vmem %s2602_s12, 32 }
  0x1e   :  { %p2337_p11 = scmp.ne.s32.totalorder %s2602_s12, %s2336_s13  ;;  %p2341_p12 = scmp.lt.s32.totalorder %s2602_s12, %s2602_s12 }
  0x1f   :  { %p2342_p13 = scmp.lt.s32.totalorder %s2340_s1, %s2336_s13 }
  0x21   :  { %p2343_p0 = por %p2342_p13, %p2341_p12 }
  0x23   :  { %p2344_p1 = pnand %p2343_p0, %p2337_p11 }
  0x25   :  { %2347 = shalt.err (!%p2344_p1)
}
  0x26   :  { %63 = dma.hbm_to_vmem [thread:$0]  %s2993_s3, 16, %s2602_s12, [#allocation9]  }
  0x27   :  { %s2540_s15 = smov [#allocation11]   ;;  %s2541_s17 = smov [#allocation14]  }
  0x28   :  { %s82_s16 = sshll.u32 %s2540_s15, 4  ;;  %s101_s18 = sshll.u32 %s2541_s17, 4  ;;  %s83_s16 = int_to_ptr.vmem [resolvable:$true] %s82_s16  ;;  %s2637_s18 = int_to_ptr.vmem [resolvable:$true] %s101_s18 }
  0x29   :  { %s2348_s23 = scalar_lea.hbm %s2995_s5, 16 }
  0x2a   :  { %p2349_p2 = scmp.ne.s32.totalorder %s2995_s5, %s2348_s23  ;;  %p2352_p3 = scmp.lt.u32.totalorder %s2348_s23, %s2995_s5 }
  0x2c   :  { %p2354_p4 = pnand %p2352_p3, %p2349_p2 }
  0x2e   :  { %2357 = shalt.err (!%p2354_p4)
}
  0x2f   :  { %s2358_s3 = scalar_lea.vmem %s83_s16, 16  ;;  %s2362_s12 = scalar_lea.vmem %s83_s16, 32 }
  0x30   :  { %p2359_p5 = scmp.ne.s32.totalorder %s83_s16, %s2358_s3  ;;  %p2363_p6 = scmp.lt.s32.totalorder %s83_s16, %s83_s16 }
  0x31   :  { %p2364_p7 = scmp.lt.s32.totalorder %s2362_s12, %s2358_s3 }
  0x33   :  { %p2365_p8 = por %p2364_p7, %p2363_p6 }
  0x35   :  { %p2366_p9 = pnand %p2365_p8, %p2359_p5 }
  0x37   :  { %2369 = shalt.err (!%p2366_p9)
}
  0x38   :  { %85 = dma.hbm_to_vmem [thread:$0]  %s2995_s5, 16, %s83_s16, [#allocation12]  }
  0x39   :  { %s2370_s13 = scalar_lea.hbm %s2997_s7, 1024 }
  0x3a   :  { %p2371_p10 = scmp.ne.s32.totalorder %s2997_s7, %s2370_s13  ;;  %p2374_p11 = scmp.lt.u32.totalorder %s2370_s13, %s2997_s7 }
  0x3c   :  { %p2376_p12 = pnand %p2374_p11, %p2371_p10 }
  0x3e   :  { %2379 = shalt.err (!%p2376_p12)
}
  0x3f   :  { %s2380_s17 = scalar_lea.vmem %s2637_s18, 1024  ;;  %p2385_p0 = scmp.lt.s32.totalorder %s2637_s18, %s2637_s18 }
  0x40   :  { %p2381_p13 = scmp.ne.s32.totalorder %s2637_s18, %s2380_s17  ;;  %p2386_p1 = scmp.lt.s32.totalorder %s2380_s17, %s2380_s17 }
  0x42   :  { %p2387_p2 = por %p2386_p1, %p2385_p0 }
  0x44   :  { %p2388_p3 = pnand %p2387_p2, %p2381_p13 }
  0x46   :  { %2391 = shalt.err (!%p2388_p3)
}
  0x47   :  { %107 = dma.hbm_to_vmem [thread:$0]  %s2997_s7, 1024, %s2637_s18, [#allocation15], %s2538_s21, %s2538_s21, %s2539_s22  }
  0x48   :  { %s2542_s19 = smov [#allocation2]   ;;  %s2543_s23 = smov [#allocation7]  }
  0x49   :  { %s25_s20 = sshll.u32 %s2542_s19, 4  ;;  %s50_s24 = sshll.u32 %s2543_s23, 4  ;;  %s26_s20 = int_to_ptr.vmem [resolvable:$true] %s25_s20  ;;  %s51_s24 = int_to_ptr.vmem [resolvable:$true] %s50_s24 }
  0x4a   :  { %s2392_s27 = scalar_lea.hbm %s2990_s0, 512 }
  0x4b   :  { %p2393_p4 = scmp.ne.s32.totalorder %s2990_s0, %s2392_s27  ;;  %p2396_p5 = scmp.lt.u32.totalorder %s2392_s27, %s2990_s0 }
  0x4d   :  { %p2398_p6 = pnand %p2396_p5, %p2393_p4 }
  0x4f   :  { %2401 = shalt.err (!%p2398_p6)
}
  0x50   :  { %s2402_s7 = scalar_lea.vmem %s26_s20, 512  ;;  %p2407_p8 = scmp.lt.s32.totalorder %s26_s20, %s26_s20 }
  0x51   :  { %p2403_p7 = scmp.ne.s32.totalorder %s26_s20, %s2402_s7  ;;  %p2408_p9 = scmp.lt.s32.totalorder %s2402_s7, %s2402_s7 }
  0x53   :  { %p2409_p10 = por %p2408_p9, %p2407_p8 }
  0x55   :  { %p2410_p11 = pnand %p2409_p10, %p2403_p7 }
  0x57   :  { %2413 = shalt.err (!%p2410_p11)
}
  0x58   :  { %31 = dma.hbm_to_vmem [thread:$0]  %s2990_s0, 512, %s26_s20, [#allocation3], %s2538_s21, %s2538_s21, %s2539_s22  }
  0x59   :  { %s2414_s1 = scalar_lea.hbm %s2992_s2, 16 }
  0x5a   :  { %p2415_p12 = scmp.ne.s32.totalorder %s2992_s2, %s2414_s1  ;;  %p2418_p13 = scmp.lt.u32.totalorder %s2414_s1, %s2992_s2 }
  0x5c   :  { %p2420_p0 = pnand %p2418_p13, %p2415_p12 }
  0x5e   :  { %2423 = shalt.err (!%p2420_p0)
}
  0x5f   :  { %s2424_s5 = scalar_lea.vmem %s51_s24, 16  ;;  %s2428_s16 = scalar_lea.vmem %s51_s24, 32 }
  0x60   :  { %p2425_p1 = scmp.ne.s32.totalorder %s51_s24, %s2424_s5  ;;  %p2429_p2 = scmp.lt.s32.totalorder %s51_s24, %s51_s24 }
  0x61   :  { %p2430_p3 = scmp.lt.s32.totalorder %s2428_s16, %s2424_s5 }
  0x63   :  { %p2431_p4 = por %p2430_p3, %p2429_p2 }
  0x65   :  { %p2432_p5 = pnand %p2431_p4, %p2425_p1 }
  0x67   :  { %2435 = shalt.err (!%p2432_p5)
}
  0x68   :  { %53 = dma.hbm_to_vmem [thread:$0]  %s2992_s2, 16, %s51_s24, [#allocation6]  }
  0x69   :  { %s2544_s20 = smov [#allocation10]   ;;  %s2545_s25 = smov [#allocation13]  }
  0x6a   :  { %s69_s23 = sshll.u32 %s2544_s20, 4  ;;  %s92_s26 = sshll.u32 %s2545_s25, 4  ;;  %s70_s23 = int_to_ptr.vmem [resolvable:$true] %s69_s23  ;;  %s93_s26 = int_to_ptr.vmem [resolvable:$true] %s92_s26 }
  0x6b   :  { %s2436_s12 = scalar_lea.hbm %s2994_s4, 3072 }
  0x6c   :  { %p2437_p6 = scmp.ne.s32.totalorder %s2994_s4, %s2436_s12  ;;  %p2440_p7 = scmp.lt.u32.totalorder %s2436_s12, %s2994_s4 }
  0x6e   :  { %p2442_p8 = pnand %p2440_p7, %p2437_p6 }
  0x70   :  { %2445 = shalt.err (!%p2442_p8)
}
  0x71   :  { %s2446_s2 = scalar_lea.vmem %s70_s23, 3072  ;;  %p2451_p10 = scmp.lt.s32.totalorder %s70_s23, %s70_s23 }
  0x72   :  { %p2447_p9 = scmp.ne.s32.totalorder %s70_s23, %s2446_s2  ;;  %p2452_p11 = scmp.lt.s32.totalorder %s2446_s2, %s2446_s2 }
  0x74   :  { %p2453_p12 = por %p2452_p11, %p2451_p10 }
  0x76   :  { %p2454_p13 = pnand %p2453_p12, %p2447_p9 }
  0x78   :  { %2457 = shalt.err (!%p2454_p13)
}
  0x79   :  { %75 = dma.hbm_to_vmem [thread:$0]  %s2994_s4, 3072, %s70_s23, [#allocation9], %s2538_s21, %s2538_s21, %s2539_s22  }
  0x7a   :  { %s2458_s1 = scalar_lea.hbm %s2996_s6, 16 }
  0x7b   :  { %p2459_p0 = scmp.ne.s32.totalorder %s2996_s6, %s2458_s1  ;;  %p2462_p1 = scmp.lt.u32.totalorder %s2458_s1, %s2996_s6 }
  0x7d   :  { %p2464_p2 = pnand %p2462_p1, %p2459_p0 }
  0x7f   :  { %2467 = shalt.err (!%p2464_p2)
}
  0x80   :  { %s2468_s5 = scalar_lea.vmem %s93_s26, 16  ;;  %s2472_s16 = scalar_lea.vmem %s93_s26, 32 }
  0x81   :  { %p2469_p3 = scmp.ne.s32.totalorder %s93_s26, %s2468_s5  ;;  %p2473_p4 = scmp.lt.s32.totalorder %s93_s26, %s93_s26 }
  0x82   :  { %p2474_p5 = scmp.lt.s32.totalorder %s2472_s16, %s2468_s5 }
  0x84   :  { %p2475_p6 = por %p2474_p5, %p2473_p4 }
  0x86   :  { %p2476_p7 = pnand %p2475_p6, %p2469_p3 }
  0x88   :  { %2479 = shalt.err (!%p2476_p7)
}
  0x89   :  { %95 = dma.hbm_to_vmem [thread:$0]  %s2996_s6, 16, %s93_s26, [#allocation12]  }
  0x8a   :  { %s2546_s19 = smov [#allocation16]   ;;  %s2480_s27 = scalar_lea.hbm %s2998_s8, 64 }
  0x8b   :  { %s114_s20 = sshll.u32 %s2546_s19, 4  ;;  %p2481_p8 = scmp.ne.s32.totalorder %s2998_s8, %s2480_s27  ;;  %s115_s20 = int_to_ptr.vmem [resolvable:$true] %s114_s20 }
  0x8c   :  { %p2484_p9 = scmp.lt.u32.totalorder %s2480_s27, %s2998_s8 }
  0x8e   :  { %p2486_p10 = pnand %p2484_p9, %p2481_p8 }
  0x90   :  { %2489 = shalt.err (!%p2486_p10)
}
  0x91   :  { %s2490_s7 = scalar_lea.vmem %s115_s20, 64  ;;  %p2495_p12 = scmp.lt.s32.totalorder %s115_s20, %s115_s20 }
  0x92   :  { %p2491_p11 = scmp.ne.s32.totalorder %s115_s20, %s2490_s7  ;;  %p2496_p13 = scmp.lt.s32.totalorder %s2490_s7, %s2490_s7 }
  0x94   :  { %p2497_p0 = por %p2496_p13, %p2495_p12 }
  0x96   :  { %p2498_p1 = pnand %p2497_p0, %p2491_p11 }
  0x98   :  { %2501 = shalt.err (!%p2498_p1)
}
  0x99   :  { %117 = dma.hbm_to_vmem [thread:$0]  %s2998_s8, 64, %s115_s20, [#allocation15]  }
  0x9a   :  { %2524 = dma.done.wait [#allocation3], 512  }
  0x9b   :  { %2525 = vsyncadd [#allocation3], 4294966784 }
  0x9c   :  { %2526 = dma.done.wait [#allocation6], 3088  }
  0x9d   :  { %2527 = vsyncadd [#allocation6], 4294964208 }
  0x9e   :  { %2528 = dma.done.wait [#allocation9], 3088  }
  0x9f   :  { %2529 = vsyncadd [#allocation9], 4294964208 }
  0xa0   :  { %2530 = dma.done.wait [#allocation12], 32  }
  0xa1   :  { %2531 = vsyncadd [#allocation12], 4294967264 }
  0xa2   :  { %2532 = dma.done.wait [#allocation15], 1088  }
  0xa3   :  { %2533 = vsyncadd [#allocation15], 4294966208  ;;  %v184_v0 = vld [vmem:[#allocation5 + $0x40] sm:$0xff]  ;;  %v185_v1 = vld [vmem:[#allocation5 + $0x48] sm:$0xff]  ;;  %vm192_vm0 = vcmask 523264   ;;  %vm153_vm1 = vcmask 1040384  }
  0xa4   :  { %v186_v2 = vld [vmem:[#allocation5 + $0x50] sm:$0xff]  ;;  %v2124_v3 = vpack.c.bf16 %v185_v1, %v184_v0  ;;  %v187_v4 = vld [vmem:[#allocation5 + $0x58] sm:$0xff]  ;;  %v188_v6 = vld [vmem:[#allocation5 + $0x60] sm:$0xff]  ;;  %vm164_vm2 = vcmask 1046528   ;;  %v2547_v59 = vmov 0.0|0.0   ;;  %vm2548_vm3 = vmmov 0  }
  0xa5   :  { %v2128_v5 = vpack.c.bf16 %v187_v4, %v186_v2  ;;  %v189_v7 = vld [vmem:[#allocation5 + $0x68] sm:$0xff]  ;;  %v2737_v8 = vld [vmem:[#allocation2] sm:$0xff]  ;;  %v190_v10 = vld [vmem:[#allocation5 + $0x70] sm:$0xff]  ;;  %2172 = vmatprep.subr.bf16.mxu1 %v2547_v59  ;;  %vm517_vm4 = vcmask 1041409   ;;  %vm716_vm5 = vcmask 1043456   ;;  %vm712_vm6 = vcmask 31744  }
  0xa6   :  { %2125 = vmatprep.subr.bf16.mxu0 %v2124_v3  ;;  %1912 = vmatprep.mubr.msk.f32.mxu0 %vm192_vm0, %v2737_v8  ;;  %v2132_v9 = vpack.c.bf16 %v189_v7, %v188_v6  ;;  %v191_v11 = vld [vmem:[#allocation5 + $0x78] sm:$0xff]  ;;  %v175_v13 = vld [vmem:[#allocation5] sm:$0xff]  ;;  %v176_v14 = vld [vmem:[#allocation5 + $0x8] sm:$0xff]  ;;  %v154_v21 = vrot.slane %v2737_v8, 7  ;;  %v165_v39 = vrot.slane %v2737_v8, 1  ;;  %s2551_s8 = smov [#allocation17]  }
  0xa7   :  { %2127 = vmatpush3.bf16.msra.mxu0 %v2124_v3  ;;  %v2136_v12 = vpack.c.bf16 %v191_v11, %v190_v10  ;;  %v2140_v15 = vpack.c.bf16 %v176_v14, %v175_v13  ;;  %v177_v16 = vld [vmem:[#allocation5 + $0x10] sm:$0xff]  ;;  %v178_v17 = vld [vmem:[#allocation5 + $0x18] sm:$0xff]  ;;  %v2741_v18 = vld [vmem:[#allocation2 + $0x8] sm:$0xff]  ;;  %s1724_s18 = sshll.u32 %s2551_s8, 4  ;;  %s1725_s18 = int_to_ptr.vmem [resolvable:$true] %s1724_s18 }
  0xa8   :  { %2129 = vmatprep.subr.bf16.mxu0 %v2128_v5  ;;  %v2144_v19 = vpack.c.bf16 %v178_v17, %v177_v16  ;;  %v2743_v20 = vld [vmem:[#allocation2 + $0x10] sm:$0xff]  ;;  %v179_v22 = vld [vmem:[#allocation5 + $0x20] sm:$0xff]  ;;  %v180_v23 = vld [vmem:[#allocation5 + $0x28] sm:$0xff]  ;;  %v162_v26 = vsel %vm153_vm1, 0.0, %v154_v21  ;;  %v155_v32 = vrot.slane %v2741_v18, 7  ;;  %v166_v40 = vrot.slane %v2741_v18, 1  ;;  %p2507_p3 = scmp.lt.s32.totalorder %s1725_s18, %s1725_s18 }
  0xa9   :  { %v2750_v24 = vld [vmem:[#allocation2 + $0x18] sm:$0xff]  ;;  %v2148_v25 = vpack.c.bf16 %v180_v23, %v179_v22  ;;  %v181_v27 = vld [vmem:[#allocation5 + $0x30] sm:$0xff]  ;;  %v382_v30 = vld [vmem:[#allocation5 + $0x80] sm:$0xff]  ;;  %v157_v34 = vrot.slane %v2743_v20, 7  ;;  %v168_v51 = vrot.slane %v2743_v20, 1  ;;  %s2502_s2 = scalar_lea.vmem %s1725_s18, 512 }
  0xaa   :  { %v182_v28 = vld [vmem:[#allocation5 + $0x38] sm:$0xff]  ;;  %v383_v31 = vld [vmem:[#allocation5 + $0x88] sm:$0xff]  ;;  %v384_v35 = vld [vmem:[#allocation5 + $0x90] sm:$0xff]  ;;  %v158_v37 = vrot.slane %v2750_v24, 7  ;;  %v156_v38 = vsel %vm153_vm1, %v154_v21, %v155_v32  ;;  %v167_v47 = vsel %vm164_vm2, %v165_v39, %v166_v40  ;;  %v169_v52 = vrot.slane %v2750_v24, 1  ;;  %p2503_p2 = scmp.ne.s32.totalorder %s1725_s18, %s2502_s2  ;;  %p2508_p4 = scmp.lt.s32.totalorder %s2502_s2, %s2502_s2 }
  0xab   :  { %2131 = vmatpush3.bf16.msra.mxu0 %v2128_v5  ;;  %v2152_v29 = vpack.c.bf16 %v182_v28, %v181_v27  ;;  %v2156_v33 = vpack.c.bf16 %v383_v31, %v382_v30  ;;  %v385_v36 = vld [vmem:[#allocation5 + $0x98] sm:$0xff]  ;;  %v163_v42 = vsel %vm153_vm1, 0.0, %v157_v34  ;;  %v386_v43 = vld [vmem:[#allocation5 + $0xa0] sm:$0xff]  ;;  %v387_v44 = vld [vmem:[#allocation5 + $0xa8] sm:$0xff]  ;;  %v173_v53 = vsel %vm164_vm2, %v166_v40, 0.0 }
  0xac   :  { %2133 = vmatprep.subr.bf16.mxu0 %v2132_v9  ;;  %v2160_v41 = vpack.c.bf16 %v385_v36, %v384_v35  ;;  %v159_v45 = vsel %vm153_vm1, %v157_v34, %v158_v37  ;;  %v2164_v46 = vpack.c.bf16 %v387_v44, %v386_v43  ;;  %v388_v48 = vld [vmem:[#allocation5 + $0xb0] sm:$0xff]  ;;  %v389_v49 = vld [vmem:[#allocation5 + $0xb8] sm:$0xff]  ;;  %v170_v54 = vsel %vm164_vm2, %v168_v51, %v169_v52  ;;  %v507_v56 = vld [vmem:[#allocation14] sm:$0xff]  ;;  %p2509_p5 = por %p2508_p4, %p2507_p3 }
  0xad   :  { %v2168_v50 = vpack.c.bf16 %v389_v49, %v388_v48  ;;  %v174_v55 = vsel %vm164_vm2, %v169_v52, 0.0  ;;  %v508_v57 = vld [vmem:[#allocation14 + $0x8] sm:$0xff]  ;;  %v509_v60 = vld [vmem:[#allocation14 + $0x10] sm:$0xff]  ;;  %v510_v61 = vld [vmem:[#allocation14 + $0x18] sm:$0xff]  ;;  %v2549_v5 = vmov 0.0  }
  0xae   :  { %v2777_v58 = vpack.c.bf16 %v508_v57, %v507_v56  ;;  %v2785_v62 = vpack.c.bf16 %v510_v61, %v509_v60  ;;  %v511_v63 = vld [vmem:[#allocation14 + $0x20] sm:$0xff]  ;;  %v512_v0 = vld [vmem:[#allocation14 + $0x28] sm:$0xff]  ;;  %v513_v2 = vld [vmem:[#allocation14 + $0x30] sm:$0xff]  ;;  %1978 = vmatprep.mubr.msk.f32.mxu1 %vm2548_vm3, %v2549_v5  ;;  %p2510_p6 = pnand %p2509_p5, %p2503_p2 }
  0xaf   :  { %2135 = vmatpush3.bf16.msra.mxu0 %v2132_v9  ;;  %v2791_v1 = vpack.c.bf16 %v512_v0, %v511_v63  ;;  %v514_v3 = vld [vmem:[#allocation14 + $0x38] sm:$0xff]  ;;  %v2851_v56 = vld [vmem:[#allocation16] sm:$0xf] }
  0xb0   :  { %2137 = vmatprep.subr.bf16.mxu0 %v2136_v12  ;;  %2174 = vmatpush3.bf16.msra.mxu1 %v2777_v58  ;;  %v2797_v4 = vpack.c.bf16 %v514_v3, %v513_v2 }
  0xb1   :  { %2175 = vmatprep.subr.bf16.mxu1 %v2547_v59 }
  0xb3   :  { %2139 = vmatpush3.bf16.msra.mxu0 %v2136_v12 }
  0xb4   :  { %2141 = vmatprep.subr.bf16.mxu0 %v2140_v15  ;;  %2177 = vmatpush3.bf16.msra.mxu1 %v2785_v62 }
  0xb5   :  { %2178 = vmatprep.subr.bf16.mxu1 %v2547_v59 }
  0xb6   :  { %1913 = vmatmul.mubr.msk.f32.vlgmr.msra.gmra.mrb[0].mxu0 %vm192_vm0, %v2741_v18 }
  0xb7   :  { %2143 = vmatpush3.bf16.msra.mxu0 %v2140_v15  ;;  %1915 = vmatprep.mubr.msk.f32.mxu0 %vm192_vm0, %v2743_v20 }
  0xb8   :  { %2145 = vmatprep.subr.bf16.mxu0 %v2144_v19  ;;  %2180 = vmatpush3.bf16.msra.mxu1 %v2791_v1 }
  0xb9   :  { %2181 = vmatprep.subr.bf16.mxu1 %v2547_v59 }
  0xba   :  { %1916 = vmatmul.mubr.msk.f32.gmra.mrb[2].mxu0 %vm192_vm0, %v2750_v24 }
  0xbb   :  { %2147 = vmatpush3.bf16.msra.mxu0 %v2144_v19  ;;  %1934 = vmatprep.mubr.msk.f32.mxu0 %vm192_vm0, %v162_v26 }
  0xbc   :  { %2149 = vmatprep.subr.bf16.mxu0 %v2148_v25  ;;  %2183 = vmatpush3.bf16.msra.mxu1 %v2797_v4 }
  0xbd   :  { %2184 = vmatprep.subr.bf16.mxu1 %v2547_v59 }
  0xbf   :  { %2151 = vmatpush3.bf16.msra.mxu0 %v2148_v25 }
  0xc0   :  { %2153 = vmatprep.subr.bf16.mxu0 %v2152_v29 }
  0xc3   :  { %2155 = vmatpush3.bf16.msra.mxu0 %v2152_v29 }
  0xc4   :  { %2157 = vmatprep.subr.bf16.mxu0 %v2156_v33 }
  0xc6   :  { %1935 = vmatmul.mubr.msk.f32.vlgmr.msra.gmra.mrb[0].mxu0 %vm192_vm0, %v156_v38 }
  0xc7   :  { %2159 = vmatpush3.bf16.msra.mxu0 %v2156_v33  ;;  %1937 = vmatprep.mubr.msk.f32.mxu0 %vm192_vm0, %v163_v42 }
  0xc8   :  { %2161 = vmatprep.subr.bf16.mxu0 %v2160_v41 }
  0xca   :  { %1938 = vmatmul.mubr.msk.f32.gmra.mrb[2].mxu0 %vm192_vm0, %v159_v45 }
  0xcb   :  { %2163 = vmatpush3.bf16.msra.mxu0 %v2160_v41  ;;  %1956 = vmatprep.mubr.msk.f32.mxu0 %vm192_vm0, %v167_v47 }
  0xcc   :  { %2165 = vmatprep.subr.bf16.mxu0 %v2164_v46 }
  0xcf   :  { %2167 = vmatpush3.bf16.msra.mxu0 %v2164_v46 }
  0xd0   :  { %2169 = vmatprep.subr.bf16.mxu0 %v2168_v50 }
  0xd3   :  { %2171 = vmatpush3.bf16.msra.mxu0 %v2168_v50 }
  0xd4   :  { %2244 = vmatprep.subr.bf16.mxu0 %v2547_v59 }
  0xd6   :  { %1957 = vmatmul.mubr.msk.f32.vlgmr.msra.gmra.mrb[0].mxu0 %vm192_vm0, %v173_v53 }
  0xd7   :  { %1959 = vmatprep.mubr.msk.f32.mxu0 %vm192_vm0, %v170_v54  ;;  %2246 = vmatpush3.bf16.msra.mxu0 %v2777_v58 }
  0xd8   :  { %2247 = vmatprep.subr.bf16.mxu0 %v2547_v59 }
  0xda   :  { %1960 = vmatmul.mubr.msk.f32.gmra.mrb[2].mxu0 %vm192_vm0, %v174_v55 }
  0xdb   :  { %2249 = vmatpush3.bf16.msra.mxu0 %v2785_v62  ;;  %2092 = vmatprep.mubr.msk.f32.mxu0 %vm2548_vm3, %v2549_v5 }
  0xdc   :  { %2250 = vmatprep.subr.bf16.mxu0 %v2547_v59 }
  0xdf   :  { %2252 = vmatpush3.bf16.msra.mxu0 %v2791_v1 }
  0xe0   :  { %2253 = vmatprep.subr.bf16.mxu0 %v2547_v59 }
  0xe3   :  { %2255 = vmatpush3.bf16.msra.mxu0 %v2797_v4 }
  0xe4   :  { %2256 = vmatprep.subr.bf16.mxu0 %v2547_v59 }
 0x1a9   :  { %v2807_v6 = vpop.f32.mrb[0].mxu0 }
 0x1aa   :  { %v490_v7 = vsel %vm192_vm0, %v2807_v6, 0.0  ;;  %v592_v9 = vmul.f32 %v2807_v6, %v2807_v6  ;;  %v2813_v10 = vpop.f32.mrb[1].mxu0 }
 0x1ab   :  { %v489_v11 = vsel %vm192_vm0, %v2813_v10, 0.0  ;;  %v591_v12 = vmul.f32 %v2813_v10, %v2813_v10 }
 0x1ac   :  { %v596_v13 = vsel %vm192_vm0, %v592_v9, 0.0  ;;  %v491_v14 = vadd.f32 %v490_v7, %v489_v11  ;;  %v1754_v11 = vld [vmem:[#allocation7] ss:$0 sm:$0xff] }
 0x1ad   :  { %v595_v15 = vsel %vm192_vm0, %v591_v12, 0.0  ;;  %v2821_v16 = vpop.f32.mrb[2].mxu0  ;;  %v974_v12 = vld [vmem:[#allocation10 + $0x40] sm:$0xff] }
 0x1ae   :  { %v492_v17 = vrot.slane %v491_v14, 4  ;;  %v597_v19 = vadd.f32 %v596_v13, %v595_v15  ;;  %v499_v21 = vsel %vm192_vm0, %v2821_v16, 0.0  ;;  %v594_v22 = vmul.f32 %v2821_v16, %v2821_v16  ;;  %v2827_v23 = vpop.f32.mrb[3].mxu0  ;;  %v975_v13 = vld [vmem:[#allocation10 + $0x48] sm:$0xff] }
 0x1af   :  { %v498_v25 = vsel %vm192_vm0, %v2827_v23, 0.0  ;;  %v593_v26 = vmul.f32 %v2827_v23, %v2827_v23 }
 0x1b0   :  { %v493_v27 = vadd.f32 %v492_v17, %v491_v14  ;;  %v598_v28 = vrot.slane %v597_v19, 4  ;;  %v605_v29 = vsel %vm192_vm0, %v594_v22, 0.0  ;;  %v500_v30 = vadd.f32 %v499_v21, %v498_v25  ;;  %v976_v25 = vld [vmem:[#allocation10 + $0x50] sm:$0xff] }
 0x1b1   :  { %v604_v31 = vsel %vm192_vm0, %v593_v26, 0.0  ;;  %v2196_v17 = vpack.c.bf16 %v975_v13, %v974_v12  ;;  %v977_v26 = vld [vmem:[#allocation10 + $0x58] sm:$0xff]  ;;  %v967_v12 = vld [vmem:[#allocation10 + $0x10] sm:$0xff] }
 0x1b2   :  { %v494_v32 = vrot.slane %v493_v27, 2  ;;  %v599_v33 = vadd.f32 %v598_v28, %v597_v19  ;;  %v501_v34 = vrot.slane %v500_v30, 4  ;;  %v606_v35 = vadd.f32 %v605_v29, %v604_v31  ;;  %v1755_v19 = vld [vmem:[#allocation8] ss:$0 sm:$0xff]  ;;  %v978_v28 = vld [vmem:[#allocation10 + $0x60] sm:$0xff]  ;;  %v979_v29 = vld [vmem:[#allocation10 + $0x68] sm:$0xff] }
 0x1b3   :  { %v980_v31 = vld [vmem:[#allocation10 + $0x70] sm:$0xff]  ;;  %v968_v13 = vld [vmem:[#allocation10 + $0x18] sm:$0xff] }
 0x1b4   :  { %v495_v36 = vadd.f32 %v494_v32, %v493_v27  ;;  %v600_v37 = vrot.slane %v599_v33, 2  ;;  %v502_v38 = vadd.f32 %v501_v34, %v500_v30  ;;  %v607_v39 = vrot.slane %v606_v35, 4  ;;  %v981_v32 = vld [vmem:[#allocation10 + $0x78] sm:$0xff]  ;;  %v965_v34 = vld [vmem:[#allocation10] sm:$0xff] }
 0x1b5   :  { %v2200_v27 = vpack.c.bf16 %v977_v26, %v976_v25  ;;  %v2204_v30 = vpack.c.bf16 %v979_v29, %v978_v28  ;;  %v970_v25 = vld [vmem:[#allocation10 + $0x28] sm:$0xff] }
 0x1b6   :  { %v601_v40 = vadd.f32 %v600_v37, %v599_v33  ;;  %v503_v41 = vrot.slane %v502_v38, 2  ;;  %v608_v42 = vadd.f32 %v607_v39, %v606_v35  ;;  %v496_v45 = vrot.slane %v495_v36, 1  ;;  %v966_v35 = vld [vmem:[#allocation10 + $0x8] sm:$0xff] }
 0x1b7   :  { %v2208_v33 = vpack.c.bf16 %v981_v32, %v980_v31  ;;  %v2550_v37 = vmov 1966171168   ;;  %v867_v39 = vlaneseq }
 0x1b8   :  { %v504_v43 = vadd.f32 %v503_v41, %v502_v38  ;;  %v609_v44 = vrot.slane %v608_v42, 2  ;;  %v602_v48 = vrot.slane %v601_v40, 1  ;;  %v497_v49 = vadd.f32 %v496_v45, %v495_v36 }
 0x1b9   :  { %v2212_v36 = vpack.c.bf16 %v966_v35, %v965_v34  ;;  %v865_v38 = vunpack.c.l.s4 %v2550_v37  ;;  %v868_v41 = vshrl.u32 %v867_v39, 7  ;;  %v972_v39 = vld [vmem:[#allocation10 + $0x38] sm:$0xff] }
 0x1ba   :  { %v610_v46 = vadd.f32 %v609_v44, %v608_v42  ;;  %v505_v47 = vrot.slane %v504_v43, 1  ;;  %v603_v53 = vadd.f32 %v602_v48, %v601_v40 }
 0x1bb   :  { %v866_v40 = vunpack.c.0.s8 %v865_v38  ;;  %v2865_v45 = vsub.s32 0, %v868_v41  ;;  %v971_v38 = vld [vmem:[#allocation10 + $0x30] sm:$0xff] }
 0x1bc   :  { %v506_v50 = vadd.f32 %v505_v47, %v504_v43  ;;  %v611_v51 = vrot.slane %v610_v46, 1 }
 0x1bd   :  { %v2862_v42 = vsub.s32 %v866_v40, %v868_v41  ;;  %v1171_v41 = vld [vmem:[#allocation10 + $0x80] sm:$0xff] }
 0x1be   :  { %v518_v52 = vsel %vm517_vm4, %v506_v50, %v497_v49  ;;  %v612_v54 = vadd.f32 %v611_v51, %v610_v46 }
 0x1bf   :  { %1979 = vmatmul.mubr.msk.f32.vlgmr.msra.gmra.mrb[0].mxu1 %vm192_vm0, %v518_v52 }
 0x1c0   :  { %2186 = vmatpush3.bf16.msra.mxu1 %v2777_v58  ;;  %1997 = vmatprep.mubr.msk.f32.mxu1 %vm2548_vm3, %v2549_v5  ;;  %v615_v55 = vsel %vm517_vm4, %v612_v54, %v603_v53 }
 0x1c1   :  { %2187 = vmatprep.subr.bf16.mxu1 %v2547_v59 }
 0x1c4   :  { %2189 = vmatpush3.bf16.msra.mxu1 %v2785_v62 }
 0x1c5   :  { %2190 = vmatprep.subr.bf16.mxu1 %v2547_v59 }
 0x1c8   :  { %2192 = vmatpush3.bf16.msra.mxu1 %v2791_v1 }
 0x1c9   :  { %2193 = vmatprep.subr.bf16.mxu1 %v2547_v59 }
 0x1cc   :  { %2195 = vmatpush3.bf16.msra.mxu1 %v2797_v4 }
 0x1cd   :  { %2000 = vmatprep.subr.mxu1 %v2549_v5 }
 0x1cf   :  { %1998 = vmatmul.mubr.msk.f32.vlgmr.msra.gmra.mrb[2].mxu1 %vm192_vm0, %v615_v55 }
 0x1d0   :  { %2002 = vmatprep.mubr.msk.f32.mxu1 %vm2548_vm3, %v2549_v5  ;;  %2001 = vmatpush3.msk.msra.mxu1 %vm716_vm5, %v2851_v56 }
 0x1d1   :  { %2005 = vmatprep.subr.mxu1 %v2549_v5 }
 0x292   :  { %v587_v57 = vpop.f32.mrb[0].mxu1 }
 0x293   :  { %v1980_v60 = vpop.f32.mrb[1].mxu1  ;;  %v688_v61 = vmul.f32 0.00390625, %v587_v57 }
 0x295   :  { %v690_v0 = vmul.f32 %v688_v61, %v688_v61 }
 0x2a2   :  { %v684_v63 = vpop.f32.mrb[2].mxu1 }
 0x2a3   :  { %v689_v2 = vmul.f32 0.00390625, %v684_v63  ;;  %v1999_v3 = vpop.f32.mrb[3].mxu1 }
 0x2a5   :  { %v691_v7 = vsub.f32 %v689_v2, %v690_v0 }
 0x2a7   :  { %v692_v9 = vadd.f32 1e-05, %v691_v7 }
 0x2a9   :  { %2300 = vrsqrt.f32 %v692_v9 }
 0x2b3   :  { %v2301_v14 = vpop.eup %2300 }
 0x2b4   :  { %v701_v15 = vmul.f32 %v2301_v14, %v1754_v11 }
 0x2b6   :  { %2003 = vmatmul.mubr.msk.f32.vlgmr.msra.gmra.mrb[4].mxu1 %vm712_vm6, %v701_v15  ;;  %v703_v21 = vmul.f32 %v701_v15, %v688_v61 }
 0x2b7   :  { %2006 = vmatpush3.msk.msra.mxu1 %vm716_vm5, %v2851_v56  ;;  %2007 = vmatprep.mubr.msk.f32.mxu1 %vm2548_vm3, %v2549_v5 }
 0x2b8   :  { %v710_v22 = vsub.f32 %v1755_v19, %v703_v21  ;;  %2197 = vmatprep.subr.bf16.mxu1 %v2196_v17  ;;  %v2216_v19 = vpack.c.bf16 %v968_v13, %v967_v12 }
 0x2ba   :  { %2008 = vmatmul.mubr.msk.f32.vlgmr.msra.gmra.mrb[6].mxu1 %vm712_vm6, %v710_v22  ;;  %v969_v22 = vld [vmem:[#allocation10 + $0x20] sm:$0xff] }
 0x2bb   :  { %2199 = vmatpush3.bf16.msra.mxu1 %v2196_v17  ;;  %v2220_v34 = vpack.c.bf16 %v970_v25, %v969_v22 }
 0x2bc   :  { %2201 = vmatprep.subr.bf16.mxu1 %v2200_v27 }
 0x2bf   :  { %2203 = vmatpush3.bf16.msra.mxu1 %v2200_v27 }
 0x2c0   :  { %2205 = vmatprep.subr.bf16.mxu1 %v2204_v30 }
 0x2c3   :  { %2207 = vmatpush3.bf16.msra.mxu1 %v2204_v30 }
 0x2c4   :  { %2209 = vmatprep.subr.bf16.mxu1 %v2208_v33 }
 0x2c7   :  { %2211 = vmatpush3.bf16.msra.mxu1 %v2208_v33 }
 0x2c8   :  { %2213 = vmatprep.subr.bf16.mxu1 %v2212_v36 }
 0x389   :  { %v786_v43 = vpop.f32.mrb[4].mxu1 }
 0x38a   :  { %v870_v44 = vrot.slane %v786_v43, %v2862_v42  ;;  %v2004_v46 = vpop.f32.mrb[5].mxu1  ;;  %v1172_v43 = vld [vmem:[#allocation10 + $0x88] sm:$0xff] }
 0x38b   :  { %v1173_v46 = vld [vmem:[#allocation10 + $0x90] sm:$0xff] }
 0x38c   :  { %v871_v47 = vcombine.high %v870_v44, %v870_v44  ;;  %v878_v48 = vrot.slane %v870_v44, %v2862_v42  ;;  %v2228_v44 = vpack.c.bf16 %v1172_v43, %v1171_v41 }
 0x38d   :  { %v859_v49 = vpop.f32.mrb[6].mxu1 }
 0x38e   :  { %v885_v50 = vrot.slane %v871_v47, %v2862_v42  ;;  %v889_v51 = vrot.slane %v878_v48, %v2865_v45  ;;  %v907_v52 = vrot.slane %v859_v49, %v2862_v42  ;;  %v2009_v53 = vpop.f32.mrb[7].mxu1  ;;  %v1174_v47 = vld [vmem:[#allocation10 + $0x98] sm:$0xff]  ;;  %v1175_v49 = vld [vmem:[#allocation10 + $0xa0] sm:$0xff] }
 0x38f   :  { %v2232_v48 = vpack.c.bf16 %v1174_v47, %v1173_v46  ;;  %v1177_v53 = vld [vmem:[#allocation10 + $0xb0] sm:$0xff] }
 0x390   :  { %v893_v54 = vrot.slane %v885_v50, %v2865_v45  ;;  %v896_v55 = vmul.f32 %v889_v51, %v2813_v10  ;;  %v897_v57 = vmul.f32 %v2807_v6, %v889_v51  ;;  %v908_v60 = vcombine.high %v907_v52, %v907_v52  ;;  %v1176_v50 = vld [vmem:[#allocation10 + $0xa8] sm:$0xff] }
 0x391   :  { %v915_v61 = vrot.slane %v907_v52, %v2862_v42  ;;  %v2236_v52 = vpack.c.bf16 %v1176_v50, %v1175_v49 }
 0x392   :  { %v898_v63 = vmul.f32 %v893_v54, %v2827_v23  ;;  %v899_v0 = vmul.f32 %v2821_v16, %v893_v54  ;;  %v922_v2 = vrot.slane %v908_v60, %v2862_v42  ;;  %v1178_v54 = vld [vmem:[#allocation10 + $0xb8] sm:$0xff] }
 0x393   :  { %v926_v3 = vrot.slane %v915_v61, %v2865_v45 }
 0x394   :  { %v930_v7 = vrot.slane %v922_v2, %v2865_v45 }
 0x395   :  { %v933_v9 = vadd.f32 %v926_v3, %v896_v55  ;;  %v934_v11 = vadd.f32 %v926_v3, %v897_v57  ;;  %v2240_v55 = vpack.c.bf16 %v1178_v54, %v1177_v53 }
 0x396   :  { %v935_v10 = vadd.f32 %v930_v7, %v898_v63  ;;  %v936_v14 = vadd.f32 %v930_v7, %v899_v0 }
 0x397   :  { %v937_v6 = vmax.f32 %v933_v9, 0.0  ;;  %v938_v15 = vmax.f32 %v934_v11, 0.0 }
 0x398   :  { %v939_v17 = vmax.f32 %v935_v10, 0.0  ;;  %v940_v21 = vmax.f32 %v936_v14, 0.0 }
 0x399   :  { %v946_v23 = vrot.slane %v938_v15, 7  ;;  %2026 = vmatprep.mubr.msk.f32.mxu1 %vm192_vm0, %v937_v6  ;;  %v945_v16 = vrot.slane %v937_v6, 7  ;;  %v955_v26 = vrot.slane %v937_v6, 1  ;;  %v956_v27 = vrot.slane %v938_v15, 1 }
 0x39a   :  { %2027 = vmatmul.mubr.msk.f32.vlgmr.msra.gmra.mrb[8].mxu1 %vm192_vm0, %v938_v15  ;;  %v948_v28 = vrot.slane %v939_v17, 7  ;;  %v949_v29 = vrot.slane %v940_v21, 7  ;;  %v958_v30 = vrot.slane %v939_v17, 1  ;;  %v959_v31 = vrot.slane %v940_v21, 1 }
 0x39b   :  { %2215 = vmatpush3.bf16.msra.mxu1 %v2212_v36  ;;  %2029 = vmatprep.mubr.msk.f32.mxu1 %vm192_vm0, %v939_v17  ;;  %v947_v32 = vsel %vm153_vm1, %v945_v16, %v946_v23  ;;  %v957_v33 = vsel %vm164_vm2, %v955_v26, %v956_v27  ;;  %v953_v40 = vsel %vm153_vm1, 0.0, %v945_v16  ;;  %v2224_v36 = vpack.c.bf16 %v972_v39, %v971_v38 }
 0x39c   :  { %2217 = vmatprep.subr.bf16.mxu1 %v2216_v19  ;;  %v950_v35 = vsel %vm153_vm1, %v948_v28, %v949_v29  ;;  %v960_v37 = vsel %vm164_vm2, %v958_v30, %v959_v31  ;;  %v954_v51 = vsel %vm153_vm1, 0.0, %v948_v28  ;;  %v963_v57 = vsel %vm164_vm2, %v956_v27, 0.0 }
 0x39d   :  { %v964_v60 = vsel %vm164_vm2, %v959_v31, 0.0 }
 0x39e   :  { %2030 = vmatmul.mubr.msk.f32.gmra.mrb[10].mxu1 %vm192_vm0, %v940_v21 }
 0x39f   :  { %2219 = vmatpush3.bf16.msra.mxu1 %v2216_v19  ;;  %2048 = vmatprep.mubr.msk.f32.mxu1 %vm192_vm0, %v953_v40 }
 0x3a0   :  { %2221 = vmatprep.subr.bf16.mxu1 %v2220_v34 }
 0x3a3   :  { %2223 = vmatpush3.bf16.msra.mxu1 %v2220_v34 }
 0x3a4   :  { %2225 = vmatprep.subr.bf16.mxu1 %v2224_v36 }
 0x3a7   :  { %2227 = vmatpush3.bf16.msra.mxu1 %v2224_v36 }
 0x3a8   :  { %2229 = vmatprep.subr.bf16.mxu1 %v2228_v44 }
 0x3aa   :  { %2049 = vmatmul.mubr.msk.f32.vlgmr.msra.gmra.mrb[8].mxu1 %vm192_vm0, %v947_v32 }
 0x3ab   :  { %2051 = vmatprep.mubr.msk.f32.mxu1 %vm192_vm0, %v954_v51  ;;  %2231 = vmatpush3.bf16.msra.mxu1 %v2228_v44 }
 0x3ac   :  { %2233 = vmatprep.subr.bf16.mxu1 %v2232_v48 }
 0x3ae   :  { %2052 = vmatmul.mubr.msk.f32.gmra.mrb[10].mxu1 %vm192_vm0, %v950_v35 }
 0x3af   :  { %2235 = vmatpush3.bf16.msra.mxu1 %v2232_v48  ;;  %2070 = vmatprep.mubr.msk.f32.mxu1 %vm192_vm0, %v957_v33 }
 0x3b0   :  { %2237 = vmatprep.subr.bf16.mxu1 %v2236_v52 }
 0x3b3   :  { %2239 = vmatpush3.bf16.msra.mxu1 %v2236_v52 }
 0x3b4   :  { %2241 = vmatprep.subr.bf16.mxu1 %v2240_v55 }
 0x3b7   :  { %2243 = vmatpush3.bf16.msra.mxu1 %v2240_v55 }
 0x3ba   :  { %2071 = vmatmul.mubr.msk.f32.vlgmr.msra.gmra.mrb[8].mxu1 %vm192_vm0, %v963_v57 }
 0x3bb   :  { %2073 = vmatprep.mubr.msk.f32.mxu1 %vm192_vm0, %v960_v37 }
 0x3be   :  { %2074 = vmatmul.mubr.msk.f32.gmra.mrb[10].mxu1 %vm192_vm0, %v964_v60  ;;  %v1774_v60 = vld [vmem:[#allocation11] ss:$0 sm:$0xff] }
 0x48d   :  { %v2900_v61 = vpop.f32.mrb[8].mxu1 }
 0x48e   :  { %v1279_v63 = vsel %vm192_vm0, %v2900_v61, 0.0  ;;  %v1372_v0 = vmul.f32 %v2900_v61, %v2900_v61  ;;  %v2906_v2 = vpop.f32.mrb[9].mxu1 }
 0x48f   :  { %v1278_v3 = vsel %vm192_vm0, %v2906_v2, 0.0  ;;  %v1371_v7 = vmul.f32 %v2906_v2, %v2906_v2 }
 0x490   :  { %v1376_v9 = vsel %vm192_vm0, %v1372_v0, 0.0  ;;  %v1280_v11 = vadd.f32 %v1279_v63, %v1278_v3  ;;  %v1775_v3 = vld [vmem:[#allocation13] ss:$0 sm:$0xff] }
 0x491   :  { %v1375_v12 = vsel %vm192_vm0, %v1371_v7, 0.0  ;;  %v2914_v13 = vpop.f32.mrb[10].mxu1 }
 0x492   :  { %v1281_v10 = vrot.slane %v1280_v11, 4  ;;  %v1377_v14 = vadd.f32 %v1376_v9, %v1375_v12  ;;  %v1288_v6 = vsel %vm192_vm0, %v2914_v13, 0.0  ;;  %v1374_v15 = vmul.f32 %v2914_v13, %v2914_v13  ;;  %v2920_v17 = vpop.f32.mrb[11].mxu1 }
 0x493   :  { %v1287_v19 = vsel %vm192_vm0, %v2920_v17, 0.0  ;;  %v1373_v21 = vmul.f32 %v2920_v17, %v2920_v17 }
 0x494   :  { %v1282_v23 = vadd.f32 %v1281_v10, %v1280_v11  ;;  %v1378_v16 = vrot.slane %v1377_v14, 4  ;;  %v1385_v22 = vsel %vm192_vm0, %v1374_v15, 0.0  ;;  %v1289_v25 = vadd.f32 %v1288_v6, %v1287_v19 }
 0x495   :  { %v1384_v26 = vsel %vm192_vm0, %v1373_v21, 0.0 }
 0x496   :  { %v1283_v27 = vrot.slane %v1282_v23, 2  ;;  %v1379_v28 = vadd.f32 %v1378_v16, %v1377_v14  ;;  %v1290_v29 = vrot.slane %v1289_v25, 4  ;;  %v1386_v30 = vadd.f32 %v1385_v22, %v1384_v26 }
 0x498   :  { %v1284_v31 = vadd.f32 %v1283_v27, %v1282_v23  ;;  %v1380_v32 = vrot.slane %v1379_v28, 2  ;;  %v1291_v33 = vadd.f32 %v1290_v29, %v1289_v25  ;;  %v1387_v34 = vrot.slane %v1386_v30, 4 }
 0x49a   :  { %v1381_v35 = vadd.f32 %v1380_v32, %v1379_v28  ;;  %v1292_v37 = vrot.slane %v1291_v33, 2  ;;  %v1388_v38 = vadd.f32 %v1387_v34, %v1386_v30  ;;  %v1285_v39 = vrot.slane %v1284_v31, 1 }
 0x49c   :  { %v1293_v40 = vadd.f32 %v1292_v37, %v1291_v33  ;;  %v1389_v36 = vrot.slane %v1388_v38, 2  ;;  %v1382_v44 = vrot.slane %v1381_v35, 1  ;;  %v1286_v46 = vadd.f32 %v1285_v39, %v1284_v31 }
 0x49e   :  { %v1294_v41 = vrot.slane %v1293_v40, 1  ;;  %v1390_v43 = vadd.f32 %v1389_v36, %v1388_v38  ;;  %v1383_v50 = vadd.f32 %v1382_v44, %v1381_v35 }
 0x4a0   :  { %v1295_v47 = vadd.f32 %v1294_v41, %v1293_v40  ;;  %v1391_v48 = vrot.slane %v1390_v43, 1 }
 0x4a2   :  { %v1298_v49 = vsel %vm517_vm4, %v1295_v47, %v1286_v46  ;;  %v1392_v51 = vadd.f32 %v1391_v48, %v1390_v43 }
 0x4a3   :  { %2093 = vmatmul.mubr.msk.f32.vlgmr.msra.gmra.mrb[4].mxu0 %vm192_vm0, %v1298_v49 }
 0x4a4   :  { %2258 = vmatpush3.bf16.msra.mxu0 %v2777_v58  ;;  %2111 = vmatprep.mubr.msk.f32.mxu0 %vm2548_vm3, %v2549_v5  ;;  %v1395_v52 = vsel %vm517_vm4, %v1392_v51, %v1383_v50 }
 0x4a5   :  { %2259 = vmatprep.subr.bf16.mxu0 %v2547_v59 }
 0x4a8   :  { %2261 = vmatpush3.bf16.msra.mxu0 %v2785_v62 }
 0x4a9   :  { %2262 = vmatprep.subr.bf16.mxu0 %v2547_v59 }
 0x4ac   :  { %2264 = vmatpush3.bf16.msra.mxu0 %v2791_v1 }
 0x4ad   :  { %2265 = vmatprep.subr.bf16.mxu0 %v2547_v59 }
 0x4b0   :  { %2267 = vmatpush3.bf16.msra.mxu0 %v2797_v4 }
 0x4b1   :  { %2114 = vmatprep.subr.mxu0 %v2549_v5 }
 0x4b3   :  { %2112 = vmatmul.mubr.msk.f32.vlgmr.msra.gmra.mrb[6].mxu0 %vm192_vm0, %v1395_v52 }
 0x4b4   :  { %2115 = vmatpush3.msk.msra.mxu0 %vm716_vm5, %v2851_v56  ;;  %2116 = vmatprep.mubr.msk.f32.mxu0 %vm2548_vm3, %v2549_v5 }
 0x4b5   :  { %2119 = vmatprep.subr.mxu0 %v2549_v5 }
 0x576   :  { %v1367_v58 = vpop.f32.mrb[4].mxu0 }
 0x577   :  { %v2094_v62 = vpop.f32.mrb[5].mxu0  ;;  %v1468_v53 = vmul.f32 0.00390625, %v1367_v58 }
 0x579   :  { %v1470_v54 = vmul.f32 %v1468_v53, %v1468_v53 }
 0x586   :  { %v1464_v1 = vpop.f32.mrb[6].mxu0 }
 0x587   :  { %v1469_v59 = vmul.f32 0.00390625, %v1464_v1  ;;  %v2113_v55 = vpop.f32.mrb[7].mxu0 }
 0x589   :  { %v1471_v4 = vsub.f32 %v1469_v59, %v1470_v54 }
 0x58b   :  { %v1472_v57 = vadd.f32 1e-05, %v1471_v4 }
 0x58d   :  { %2302 = vrsqrt.f32 %v1472_v57 }
 0x597   :  { %v2303_v63 = vpop.eup %2302 }
 0x598   :  { %v1481_v0 = vmul.f32 %v2303_v63, %v1774_v60 }
 0x59a   :  { %2117 = vmatmul.mubr.msk.f32.vlgmr.msra.gmra.mrb[8].mxu0 %vm712_vm6, %v1481_v0  ;;  %v1483_v7 = vmul.f32 %v1481_v0, %v1468_v53 }
 0x59b   :  { %2120 = vmatpush3.msk.msra.mxu0 %vm716_vm5, %v2851_v56  ;;  %2121 = vmatprep.mubr.msk.f32.mxu0 %vm2548_vm3, %v2549_v5 }
 0x59c   :  { %v1490_v9 = vsub.f32 %v1775_v3, %v1483_v7 }
 0x59e   :  { %2122 = vmatmul.mubr.msk.f32.vlgmr.msra.gmra.mrb[10].mxu0 %vm712_vm6, %v1490_v9 }
 0x66d   :  { %v1560_v11 = vpop.f32.mrb[8].mxu0 }
 0x66e   :  { %v1644_v12 = vrot.slane %v1560_v11, %v2862_v42  ;;  %v2118_v10 = vpop.f32.mrb[9].mxu0 }
 0x670   :  { %v1645_v14 = vcombine.high %v1644_v12, %v1644_v12  ;;  %v1652_v6 = vrot.slane %v1644_v12, %v2862_v42 }
 0x671   :  { %v1633_v15 = vpop.f32.mrb[10].mxu0 }
 0x672   :  { %v1659_v19 = vrot.slane %v1645_v14, %v2862_v42  ;;  %v1663_v21 = vrot.slane %v1652_v6, %v2865_v45  ;;  %v1681_v56 = vrot.slane %v1633_v15, %v2862_v42  ;;  %v2123_v23 = vpop.f32.mrb[11].mxu0 }
 0x674   :  { %v1667_v5 = vrot.slane %v1659_v19, %v2865_v45  ;;  %v1670_v16 = vmul.f32 %v1663_v21, %v2906_v2  ;;  %v1671_v22 = vmul.f32 %v2900_v61, %v1663_v21  ;;  %v1682_v25 = vcombine.high %v1681_v56, %v1681_v56 }
 0x675   :  { %v1689_v26 = vrot.slane %v1681_v56, %v2862_v42 }
 0x676   :  { %v1672_v27 = vmul.f32 %v1667_v5, %v2920_v17  ;;  %v1673_v28 = vmul.f32 %v2914_v13, %v1667_v5  ;;  %v1696_v29 = vrot.slane %v1682_v25, %v2862_v42 }
 0x677   :  { %v1700_v30 = vrot.slane %v1689_v26, %v2865_v45 }
 0x678   :  { %v1704_v31 = vrot.slane %v1696_v29, %v2865_v45 }
 0x679   :  { %v1707_v32 = vadd.f32 %v1700_v30, %v1670_v16  ;;  %v1708_v33 = vadd.f32 %v1700_v30, %v1671_v22 }
 0x67a   :  { %v1709_v2 = vadd.f32 %v1704_v31, %v1672_v27  ;;  %v1710_v34 = vadd.f32 %v1704_v31, %v1673_v28 }
 0x67b   :  { %v1711_v61 = vadd.f32 %v1707_v32, %v2737_v8  ;;  %v1712_v35 = vadd.f32 %v1708_v33, %v2741_v18 }
 0x67c   :  { %v1713_v17 = vadd.f32 %v1709_v2, %v2743_v20  ;;  %v1714_v13 = vadd.f32 %v1710_v34, %v2750_v24 }
 0x67d   :  { %1715 = vst.msk [vmem:[#allocation17] sm:$0xff] %vm192_vm0, %v1711_v61  ;;  %1716 = vst.msk [vmem:[#allocation17 + $0x8] sm:$0xff] %vm192_vm0, %v1712_v35 }
 0x67e   :  { %1717 = vst.msk [vmem:[#allocation17 + $0x10] sm:$0xff] %vm192_vm0, %v1713_v17  ;;  %1718 = vst.msk [vmem:[#allocation17 + $0x18] sm:$0xff] %vm192_vm0, %v1714_v13 }
 0x67f   :  { %2513 = shalt.err (!%p2510_p6)
}
 0x680   :  { %s2514_s11 = scalar_lea.hbm %s2999_s9, 512 }
 0x681   :  { %p2515_p7 = scmp.ne.s32.totalorder %s2999_s9, %s2514_s11  ;;  %p2518_p8 = scmp.lt.u32.totalorder %s2514_s11, %s2999_s9 }
 0x683   :  { %p2520_p9 = pnand %p2518_p8, %p2515_p7 }
 0x685   :  { %2523 = shalt.err (!%p2520_p9)
}
 0x686   :  { %1730 = dma.vmem_to_hbm [thread:$0]  %s1725_s18, 512, %s2999_s9, [#allocation4], %s2538_s21, %s2538_s21, %s2539_s22  }
 0x687   :  { %2534 = dma.done.wait [#allocation4], 512  }
 0x688   :  { %2535 = vsyncadd [#allocation4], 4294966784 }
 0x689   :  { %1734 = vsyncpa [#allocation3], 1 }
 0x68a   :  { %1735 = vsyncpa [#allocation6], 1 }
 0x68b   :  { %1736 = vsyncpa [#allocation9], 1 }
 0x68c   :  { %1737 = vsyncpa [#allocation12], 1 }
 0x68d   :  { %1738 = vsyncpa [#allocation15], 1 }
 0x68e   :  { %1739 = vsyncpa [#allocation4], 1 }

// kernel: tpu_custom_call.1
= control target key start
LH: loop header
LB: loop body
LE: loop exit
PB: predicated region body
PF: predicated region fallthrough
CT: control target
= control target key end

     0   :  { %14 = vsyncpa [#allocation3], 0  ;;  %s2990_s0 = inlined_call_operand.hbm [shape: f32[2,16,64], index: 0, kind: input, shape index: {}]   ;;  %s2991_s1 = inlined_call_operand.hbm [shape: f32[3,64,64], index: 1, kind: input, shape index: {}]   ;;  %s2992_s2 = inlined_call_operand.hbm [shape: f32[1,4], index: 2, kind: input, shape index: {}]   ;;  %s2993_s3 = inlined_call_operand.hbm [shape: f32[1,4], index: 3, kind: input, shape index: {}]   ;;  %s2994_s4 = inlined_call_operand.hbm [shape: f32[3,64,64], index: 4, kind: input, shape index: {}]   ;;  %s2995_s5 = inlined_call_operand.hbm [shape: f32[1,4], index: 5, kind: input, shape index: {}]   ;;  %s2996_s6 = inlined_call_operand.hbm [shape: f32[1,4], index: 6, kind: input, shape index: {}]   ;;  %s2997_s7 = inlined_call_operand.hbm [shape: f32[64,4], index: 7, kind: input, shape index: {}]   ;;  %s2998_s8 = inlined_call_operand.hbm [shape: f32[4,64], index: 8, kind: input, shape index: {}]   ;;  %s2999_s9 = inlined_call_operand.hbm [shape: f32[2,16,64], index: 9, kind: output, shape index: {}]  }
   0x1   :  { %15 = vsyncpa [#allocation6], 0 }
   0x2   :  { %16 = vsyncpa [#allocation9], 0 }
   0x3   :  { %17 = vsyncpa [#allocation12], 0 }
   0x4   :  { %18 = vsyncpa [#allocation15], 0 }
   0x5   :  { %19 = vsyncpa [#allocation4], 0  ;;  %s2536_s30 = smov [#allocation5]   ;;  %s2537_s11 = smov [#allocation8]  }
   0x6   :  { %s37_s10 = sshll.u32 %s2536_s30, 4  ;;  %s60_s12 = sshll.u32 %s2537_s11, 4  ;;  %s38_s10 = int_to_ptr.vmem [resolvable:$true] %s37_s10  ;;  %s2602_s12 = int_to_ptr.vmem [resolvable:$true] %s60_s12 }
   0x7   :  { %s2304_s15 = scalar_lea.hbm %s2991_s1, 3072 }
   0x8   :  { %p2305_p0 = scmp.ne.s32.totalorder %s2991_s1, %s2304_s15  ;;  %p2308_p1 = scmp.lt.u32.totalorder %s2304_s15, %s2991_s1 }
   0xa   :  { %p2310_p2 = pnand %p2308_p1, %p2305_p0 }
   0xc   :  { %2313 = shalt.err (!%p2310_p2)
}
   0xd   :  { %s2314_s20 = scalar_lea.vmem %s38_s10, 3072  ;;  %p2319_p4 = scmp.lt.s32.totalorder %s38_s10, %s38_s10 }
   0xe   :  { %p2315_p3 = scmp.ne.s32.totalorder %s38_s10, %s2314_s20  ;;  %p2320_p5 = scmp.lt.s32.totalorder %s2314_s20, %s2314_s20 }
  0x10   :  { %p2321_p6 = por %p2320_p5, %p2319_p4 }
  0x12   :  { %p2322_p7 = pnand %p2321_p6, %p2315_p3 }
  0x14   :  { %2325 = shalt.err (!%p2322_p7)
}
  0x15   :  { %s2538_s21 = smov 128   ;;  %s2539_s22 = smov 8  }
  0x16   :  { %43 = dma.hbm_to_vmem [thread:$0]  %s2991_s1, 3072, %s38_s10, [#allocation6], %s2538_s21, %s2538_s21, %s2539_s22  }
  0x17   :  { %s2326_s27 = scalar_lea.hbm %s2993_s3, 16 }
  0x18   :  { %p2327_p8 = scmp.ne.s32.totalorder %s2993_s3, %s2326_s27  ;;  %p2330_p9 = scmp.lt.u32.totalorder %s2326_s27, %s2993_s3 }
  0x1a   :  { %p2332_p10 = pnand %p2330_p9, %p2327_p8 }
  0x1c   :  { %2335 = shalt.err (!%p2332_p10)
}
  0x1d   :  { %s2336_s13 = scalar_lea.vmem %s2602_s12, 16  ;;  %s2340_s1 = scalar_lea.vmem %s2602_s12, 32 }
  0x1e   :  { %p2337_p11 = scmp.ne.s32.totalorder %s2602_s12, %s2336_s13  ;;  %p2341_p12 = scmp.lt.s32.totalorder %s2602_s12, %s2602_s12 }
  0x1f   :  { %p2342_p13 = scmp.lt.s32.totalorder %s2340_s1, %s2336_s13 }
  0x21   :  { %p2343_p0 = por %p2342_p13, %p2341_p12 }
  0x23   :  { %p2344_p1 = pnand %p2343_p0, %p2337_p11 }
  0x25   :  { %2347 = shalt.err (!%p2344_p1)
}
  0x26   :  { %63 = dma.hbm_to_vmem [thread:$0]  %s2993_s3, 16, %s2602_s12, [#allocation9]  }
  0x27   :  { %s2540_s15 = smov [#allocation11]   ;;  %s2541_s17 = smov [#allocation14]  }
  0x28   :  { %s82_s16 = sshll.u32 %s2540_s15, 4  ;;  %s101_s18 = sshll.u32 %s2541_s17, 4  ;;  %s83_s16 = int_to_ptr.vmem [resolvable:$true] %s82_s16  ;;  %s2637_s18 = int_to_ptr.vmem [resolvable:$true] %s101_s18 }
  0x29   :  { %s2348_s23 = scalar_lea.hbm %s2995_s5, 16 }
  0x2a   :  { %p2349_p2 = scmp.ne.s32.totalorder %s2995_s5, %s2348_s23  ;;  %p2352_p3 = scmp.lt.u32.totalorder %s2348_s23, %s2995_s5 }
  0x2c   :  { %p2354_p4 = pnand %p2352_p3, %p2349_p2 }
  0x2e   :  { %2357 = shalt.err (!%p2354_p4)
}
  0x2f   :  { %s2358_s3 = scalar_lea.vmem %s83_s16, 16  ;;  %s2362_s12 = scalar_lea.vmem %s83_s16, 32 }
  0x30   :  { %p2359_p5 = scmp.ne.s32.totalorder %s83_s16, %s2358_s3  ;;  %p2363_p6 = scmp.lt.s32.totalorder %s83_s16, %s83_s16 }
  0x31   :  { %p2364_p7 = scmp.lt.s32.totalorder %s2362_s12, %s2358_s3 }
  0x33   :  { %p2365_p8 = por %p2364_p7, %p2363_p6 }
  0x35   :  { %p2366_p9 = pnand %p2365_p8, %p2359_p5 }
  0x37   :  { %2369 = shalt.err (!%p2366_p9)
}
  0x38   :  { %85 = dma.hbm_to_vmem [thread:$0]  %s2995_s5, 16, %s83_s16, [#allocation12]  }
  0x39   :  { %s2370_s13 = scalar_lea.hbm %s2997_s7, 1024 }
  0x3a   :  { %p2371_p10 = scmp.ne.s32.totalorder %s2997_s7, %s2370_s13  ;;  %p2374_p11 = scmp.lt.u32.totalorder %s2370_s13, %s2997_s7 }
  0x3c   :  { %p2376_p12 = pnand %p2374_p11, %p2371_p10 }
  0x3e   :  { %2379 = shalt.err (!%p2376_p12)
}
  0x3f   :  { %s2380_s17 = scalar_lea.vmem %s2637_s18, 1024  ;;  %p2385_p0 = scmp.lt.s32.totalorder %s2637_s18, %s2637_s18 }
  0x40   :  { %p2381_p13 = scmp.ne.s32.totalorder %s2637_s18, %s2380_s17  ;;  %p2386_p1 = scmp.lt.s32.totalorder %s2380_s17, %s2380_s17 }
  0x42   :  { %p2387_p2 = por %p2386_p1, %p2385_p0 }
  0x44   :  { %p2388_p3 = pnand %p2387_p2, %p2381_p13 }
  0x46   :  { %2391 = shalt.err (!%p2388_p3)
}
  0x47   :  { %107 = dma.hbm_to_vmem [thread:$0]  %s2997_s7, 1024, %s2637_s18, [#allocation15], %s2538_s21, %s2538_s21, %s2539_s22  }
  0x48   :  { %s2542_s19 = smov [#allocation2]   ;;  %s2543_s23 = smov [#allocation7]  }
  0x49   :  { %s25_s20 = sshll.u32 %s2542_s19, 4  ;;  %s50_s24 = sshll.u32 %s2543_s23, 4  ;;  %s26_s20 = int_to_ptr.vmem [resolvable:$true] %s25_s20  ;;  %s51_s24 = int_to_ptr.vmem [resolvable:$true] %s50_s24 }
  0x4a   :  { %s2392_s27 = scalar_lea.hbm %s2990_s0, 512 }
  0x4b   :  { %p2393_p4 = scmp.ne.s32.totalorder %s2990_s0, %s2392_s27  ;;  %p2396_p5 = scmp.lt.u32.totalorder %s2392_s27, %s2990_s0 }
  0x4d   :  { %p2398_p6 = pnand %p2396_p5, %p2393_p4 }
  0x4f   :  { %2401 = shalt.err (!%p2398_p6)
}
  0x50   :  { %s2402_s7 = scalar_lea.vmem %s26_s20, 512  ;;  %p2407_p8 = scmp.lt.s32.totalorder %s26_s20, %s26_s20 }
  0x51   :  { %p2403_p7 = scmp.ne.s32.totalorder %s26_s20, %s2402_s7  ;;  %p2408_p9 = scmp.lt.s32.totalorder %s2402_s7, %s2402_s7 }
  0x53   :  { %p2409_p10 = por %p2408_p9, %p2407_p8 }
  0x55   :  { %p2410_p11 = pnand %p2409_p10, %p2403_p7 }
  0x57   :  { %2413 = shalt.err (!%p2410_p11)
}
  0x58   :  { %31 = dma.hbm_to_vmem [thread:$0]  %s2990_s0, 512, %s26_s20, [#allocation3], %s2538_s21, %s2538_s21, %s2539_s22  }
  0x59   :  { %s2414_s1 = scalar_lea.hbm %s2992_s2, 16 }
  0x5a   :  { %p2415_p12 = scmp.ne.s32.totalorder %s2992_s2, %s2414_s1  ;;  %p2418_p13 = scmp.lt.u32.totalorder %s2414_s1, %s2992_s2 }
  0x5c   :  { %p2420_p0 = pnand %p2418_p13, %p2415_p12 }
  0x5e   :  { %2423 = shalt.err (!%p2420_p0)
}
  0x5f   :  { %s2424_s5 = scalar_lea.vmem %s51_s24, 16  ;;  %s2428_s16 = scalar_lea.vmem %s51_s24, 32 }
  0x60   :  { %p2425_p1 = scmp.ne.s32.totalorder %s51_s24, %s2424_s5  ;;  %p2429_p2 = scmp.lt.s32.totalorder %s51_s24, %s51_s24 }
  0x61   :  { %p2430_p3 = scmp.lt.s32.totalorder %s2428_s16, %s2424_s5 }
  0x63   :  { %p2431_p4 = por %p2430_p3, %p2429_p2 }
  0x65   :  { %p2432_p5 = pnand %p2431_p4, %p2425_p1 }
  0x67   :  { %2435 = shalt.err (!%p2432_p5)
}
  0x68   :  { %53 = dma.hbm_to_vmem [thread:$0]  %s2992_s2, 16, %s51_s24, [#allocation6]  }
  0x69   :  { %s2544_s20 = smov [#allocation10]   ;;  %s2545_s25 = smov [#allocation13]  }
  0x6a   :  { %s69_s23 = sshll.u32 %s2544_s20, 4  ;;  %s92_s26 = sshll.u32 %s2545_s25, 4  ;;  %s70_s23 = int_to_ptr.vmem [resolvable:$true] %s69_s23  ;;  %s93_s26 = int_to_ptr.vmem [resolvable:$true] %s92_s26 }
  0x6b   :  { %s2436_s12 = scalar_lea.hbm %s2994_s4, 3072 }
  0x6c   :  { %p2437_p6 = scmp.ne.s32.totalorder %s2994_s4, %s2436_s12  ;;  %p2440_p7 = scmp.lt.u32.totalorder %s2436_s12, %s2994_s4 }
  0x6e   :  { %p2442_p8 = pnand %p2440_p7, %p2437_p6 }
  0x70   :  { %2445 = shalt.err (!%p2442_p8)
}
  0x71   :  { %s2446_s2 = scalar_lea.vmem %s70_s23, 3072  ;;  %p2451_p10 = scmp.lt.s32.totalorder %s70_s23, %s70_s23 }
  0x72   :  { %p2447_p9 = scmp.ne.s32.totalorder %s70_s23, %s2446_s2  ;;  %p2452_p11 = scmp.lt.s32.totalorder %s2446_s2, %s2446_s2 }
  0x74   :  { %p2453_p12 = por %p2452_p11, %p2451_p10 }
  0x76   :  { %p2454_p13 = pnand %p2453_p12, %p2447_p9 }
  0x78   :  { %2457 = shalt.err (!%p2454_p13)
}
  0x79   :  { %75 = dma.hbm_to_vmem [thread:$0]  %s2994_s4, 3072, %s70_s23, [#allocation9], %s2538_s21, %s2538_s21, %s2539_s22  }
  0x7a   :  { %s2458_s1 = scalar_lea.hbm %s2996_s6, 16 }
  0x7b   :  { %p2459_p0 = scmp.ne.s32.totalorder %s2996_s6, %s2458_s1  ;;  %p2462_p1 = scmp.lt.u32.totalorder %s2458_s1, %s2996_s6 }
  0x7d   :  { %p2464_p2 = pnand %p2462_p1, %p2459_p0 }
  0x7f   :  { %2467 = shalt.err (!%p2464_p2)
}
  0x80   :  { %s2468_s5 = scalar_lea.vmem %s93_s26, 16  ;;  %s2472_s16 = scalar_lea.vmem %s93_s26, 32 }
  0x81   :  { %p2469_p3 = scmp.ne.s32.totalorder %s93_s26, %s2468_s5  ;;  %p2473_p4 = scmp.lt.s32.totalorder %s93_s26, %s93_s26 }
  0x82   :  { %p2474_p5 = scmp.lt.s32.totalorder %s2472_s16, %s2468_s5 }
  0x84   :  { %p2475_p6 = por %p2474_p5, %p2473_p4 }
  0x86   :  { %p2476_p7 = pnand %p2475_p6, %p2469_p3 }
  0x88   :  { %2479 = shalt.err (!%p2476_p7)
}
  0x89   :  { %95 = dma.hbm_to_vmem [thread:$0]  %s2996_s6, 16, %s93_s26, [#allocation12]  }
  0x8a   :  { %s2546_s19 = smov [#allocation16]   ;;  %s2480_s27 = scalar_lea.hbm %s2998_s8, 64 }
  0x8b   :  { %s114_s20 = sshll.u32 %s2546_s19, 4  ;;  %p2481_p8 = scmp.ne.s32.totalorder %s2998_s8, %s2480_s27  ;;  %s115_s20 = int_to_ptr.vmem [resolvable:$true] %s114_s20 }
  0x8c   :  { %p2484_p9 = scmp.lt.u32.totalorder %s2480_s27, %s2998_s8 }
  0x8e   :  { %p2486_p10 = pnand %p2484_p9, %p2481_p8 }
  0x90   :  { %2489 = shalt.err (!%p2486_p10)
}
  0x91   :  { %s2490_s7 = scalar_lea.vmem %s115_s20, 64  ;;  %p2495_p12 = scmp.lt.s32.totalorder %s115_s20, %s115_s20 }
  0x92   :  { %p2491_p11 = scmp.ne.s32.totalorder %s115_s20, %s2490_s7  ;;  %p2496_p13 = scmp.lt.s32.totalorder %s2490_s7, %s2490_s7 }
  0x94   :  { %p2497_p0 = por %p2496_p13, %p2495_p12 }
  0x96   :  { %p2498_p1 = pnand %p2497_p0, %p2491_p11 }
  0x98   :  { %2501 = shalt.err (!%p2498_p1)
}
  0x99   :  { %117 = dma.hbm_to_vmem [thread:$0]  %s2998_s8, 64, %s115_s20, [#allocation15]  }
  0x9a   :  { %2524 = dma.done.wait [#allocation3], 512  }
  0x9b   :  { %2525 = vsyncadd [#allocation3], 4294966784 }
  0x9c   :  { %2526 = dma.done.wait [#allocation6], 3088  }
  0x9d   :  { %2527 = vsyncadd [#allocation6], 4294964208 }
  0x9e   :  { %2528 = dma.done.wait [#allocation9], 3088  }
  0x9f   :  { %2529 = vsyncadd [#allocation9], 4294964208 }
  0xa0   :  { %2530 = dma.done.wait [#allocation12], 32  }
  0xa1   :  { %2531 = vsyncadd [#allocation12], 4294967264 }
  0xa2   :  { %2532 = dma.done.wait [#allocation15], 1088  }
  0xa3   :  { %2533 = vsyncadd [#allocation15], 4294966208  ;;  %v184_v0 = vld [vmem:[#allocation5 + $0x40] sm:$0xff]  ;;  %v185_v1 = vld [vmem:[#allocation5 + $0x48] sm:$0xff]  ;;  %vm192_vm0 = vcmask 523264   ;;  %vm153_vm1 = vcmask 1040384  }
  0xa4   :  { %v186_v2 = vld [vmem:[#allocation5 + $0x50] sm:$0xff]  ;;  %v2124_v3 = vpack.c.bf16 %v185_v1, %v184_v0  ;;  %v187_v4 = vld [vmem:[#allocation5 + $0x58] sm:$0xff]  ;;  %v188_v6 = vld [vmem:[#allocation5 + $0x60] sm:$0xff]  ;;  %vm164_vm2 = vcmask 1046528   ;;  %v2547_v59 = vmov 0.0|0.0   ;;  %vm2548_vm3 = vmmov 0  }
  0xa5   :  { %v2128_v5 = vpack.c.bf16 %v187_v4, %v186_v2  ;;  %v189_v7 = vld [vmem:[#allocation5 + $0x68] sm:$0xff]  ;;  %v2737_v8 = vld [vmem:[#allocation2] sm:$0xff]  ;;  %v190_v10 = vld [vmem:[#allocation5 + $0x70] sm:$0xff]  ;;  %2172 = vmatprep.subr.bf16.mxu1 %v2547_v59  ;;  %vm517_vm4 = vcmask 1041409   ;;  %vm716_vm5 = vcmask 1043456   ;;  %vm712_vm6 = vcmask 31744  }
  0xa6   :  { %2125 = vmatprep.subr.bf16.mxu0 %v2124_v3  ;;  %1912 = vmatprep.mubr.msk.f32.mxu0 %vm192_vm0, %v2737_v8  ;;  %v2132_v9 = vpack.c.bf16 %v189_v7, %v188_v6  ;;  %v191_v11 = vld [vmem:[#allocation5 + $0x78] sm:$0xff]  ;;  %v175_v13 = vld [vmem:[#allocation5] sm:$0xff]  ;;  %v176_v14 = vld [vmem:[#allocation5 + $0x8] sm:$0xff]  ;;  %v154_v21 = vrot.slane %v2737_v8, 7  ;;  %v165_v39 = vrot.slane %v2737_v8, 1  ;;  %s2551_s8 = smov [#allocation17]  }
  0xa7   :  { %2127 = vmatpush3.bf16.msra.mxu0 %v2124_v3  ;;  %v2136_v12 = vpack.c.bf16 %v191_v11, %v190_v10  ;;  %v2140_v15 = vpack.c.bf16 %v176_v14, %v175_v13  ;;  %v177_v16 = vld [vmem:[#allocation5 + $0x10] sm:$0xff]  ;;  %v178_v17 = vld [vmem:[#allocation5 + $0x18] sm:$0xff]  ;;  %v2741_v18 = vld [vmem:[#allocation2 + $0x8] sm:$0xff]  ;;  %s1724_s18 = sshll.u32 %s2551_s8, 4  ;;  %s1725_s18 = int_to_ptr.vmem [resolvable:$true] %s1724_s18 }
  0xa8   :  { %2129 = vmatprep.subr.bf16.mxu0 %v2128_v5  ;;  %v2144_v19 = vpack.c.bf16 %v178_v17, %v177_v16  ;;  %v2743_v20 = vld [vmem:[#allocation2 + $0x10] sm:$0xff]  ;;  %v179_v22 = vld [vmem:[#allocation5 + $0x20] sm:$0xff]  ;;  %v180_v23 = vld [vmem:[#allocation5 + $0x28] sm:$0xff]  ;;  %v162_v26 = vsel %vm153_vm1, 0.0, %v154_v21  ;;  %v155_v32 = vrot.slane %v2741_v18, 7  ;;  %v166_v40 = vrot.slane %v2741_v18, 1  ;;  %p2507_p3 = scmp.lt.s32.totalorder %s1725_s18, %s1725_s18 }
  0xa9   :  { %v2750_v24 = vld [vmem:[#allocation2 + $0x18] sm:$0xff]  ;;  %v2148_v25 = vpack.c.bf16 %v180_v23, %v179_v22  ;;  %v181_v27 = vld [vmem:[#allocation5 + $0x30] sm:$0xff]  ;;  %v382_v30 = vld [vmem:[#allocation5 + $0x80] sm:$0xff]  ;;  %v157_v34 = vrot.slane %v2743_v20, 7  ;;  %v168_v51 = vrot.slane %v2743_v20, 1  ;;  %s2502_s2 = scalar_lea.vmem %s1725_s18, 512 }
  0xaa   :  { %v182_v28 = vld [vmem:[#allocation5 + $0x38] sm:$0xff]  ;;  %v383_v31 = vld [vmem:[#allocation5 + $0x88] sm:$0xff]  ;;  %v384_v35 = vld [vmem:[#allocation5 + $0x90] sm:$0xff]  ;;  %v158_v37 = vrot.slane %v2750_v24, 7  ;;  %v156_v38 = vsel %vm153_vm1, %v154_v21, %v155_v32  ;;  %v167_v47 = vsel %vm164_vm2, %v165_v39, %v166_v40  ;;  %v169_v52 = vrot.slane %v2750_v24, 1  ;;  %p2503_p2 = scmp.ne.s32.totalorder %s1725_s18, %s2502_s2  ;;  %p2508_p4 = scmp.lt.s32.totalorder %s2502_s2, %s2502_s2 }
  0xab   :  { %2131 = vmatpush3.bf16.msra.mxu0 %v2128_v5  ;;  %v2152_v29 = vpack.c.bf16 %v182_v28, %v181_v27  ;;  %v2156_v33 = vpack.c.bf16 %v383_v31, %v382_v30  ;;  %v385_v36 = vld [vmem:[#allocation5 + $0x98] sm:$0xff]  ;;  %v163_v42 = vsel %vm153_vm1, 0.0, %v157_v34  ;;  %v386_v43 = vld [vmem:[#allocation5 + $0xa0] sm:$0xff]  ;;  %v387_v44 = vld [vmem:[#allocation5 + $0xa8] sm:$0xff]  ;;  %v173_v53 = vsel %vm164_vm2, %v166_v40, 0.0 }
  0xac   :  { %2133 = vmatprep.subr.bf16.mxu0 %v2132_v9  ;;  %v2160_v41 = vpack.c.bf16 %v385_v36, %v384_v35  ;;  %v159_v45 = vsel %vm153_vm1, %v157_v34, %v158_v37  ;;  %v2164_v46 = vpack.c.bf16 %v387_v44, %v386_v43  ;;  %v388_v48 = vld [vmem:[#allocation5 + $0xb0] sm:$0xff]  ;;  %v389_v49 = vld [vmem:[#allocation5 + $0xb8] sm:$0xff]  ;;  %v170_v54 = vsel %vm164_vm2, %v168_v51, %v169_v52  ;;  %v507_v56 = vld [vmem:[#allocation14] sm:$0xff]  ;;  %p2509_p5 = por %p2508_p4, %p2507_p3 }
  0xad   :  { %v2168_v50 = vpack.c.bf16 %v389_v49, %v388_v48  ;;  %v174_v55 = vsel %vm164_vm2, %v169_v52, 0.0  ;;  %v508_v57 = vld [vmem:[#allocation14 + $0x8] sm:$0xff]  ;;  %v509_v60 = vld [vmem:[#allocation14 + $0x10] sm:$0xff]  ;;  %v510_v61 = vld [vmem:[#allocation14 + $0x18] sm:$0xff]  ;;  %v2549_v5 = vmov 0.0  }
  0xae   :  { %v2777_v58 = vpack.c.bf16 %v508_v57, %v507_v56  ;;  %v2785_v62 = vpack.c.bf16 %v510_v61, %v509_v60  ;;  %v511_v63 = vld [vmem:[#allocation14 + $0x20] sm:$0xff]  ;;  %v512_v0 = vld [vmem:[#allocation14 + $0x28] sm:$0xff]  ;;  %v513_v2 = vld [vmem:[#allocation14 + $0x30] sm:$0xff]  ;;  %1978 = vmatprep.mubr.msk.f32.mxu1 %vm2548_vm3, %v2549_v5  ;;  %p2510_p6 = pnand %p2509_p5, %p2503_p2 }
  0xaf   :  { %2135 = vmatpush3.bf16.msra.mxu0 %v2132_v9  ;;  %v2791_v1 = vpack.c.bf16 %v512_v0, %v511_v63  ;;  %v514_v3 = vld [vmem:[#allocation14 + $0x38] sm:$0xff]  ;;  %v2851_v56 = vld [vmem:[#allocation16] sm:$0xf] }
  0xb0   :  { %2137 = vmatprep.subr.bf16.mxu0 %v2136_v12  ;;  %2174 = vmatpush3.bf16.msra.mxu1 %v2777_v58  ;;  %v2797_v4 = vpack.c.bf16 %v514_v3, %v513_v2 }
  0xb1   :  { %2175 = vmatprep.subr.bf16.mxu1 %v2547_v59 }
  0xb3   :  { %2139 = vmatpush3.bf16.msra.mxu0 %v2136_v12 }
  0xb4   :  { %2141 = vmatprep.subr.bf16.mxu0 %v2140_v15  ;;  %2177 = vmatpush3.bf16.msra.mxu1 %v2785_v62 }
  0xb5   :  { %2178 = vmatprep.subr.bf16.mxu1 %v2547_v59 }
  0xb6   :  { %1913 = vmatmul.mubr.msk.f32.vlgmr.msra.gmra.mrb[0].mxu0 %vm192_vm0, %v2741_v18 }
  0xb7   :  { %2143 = vmatpush3.bf16.msra.mxu0 %v2140_v15  ;;  %1915 = vmatprep.mubr.msk.f32.mxu0 %vm192_vm0, %v2743_v20 }
  0xb8   :  { %2145 = vmatprep.subr.bf16.mxu0 %v2144_v19  ;;  %2180 = vmatpush3.bf16.msra.mxu1 %v2791_v1 }
  0xb9   :  { %2181 = vmatprep.subr.bf16.mxu1 %v2547_v59 }
  0xba   :  { %1916 = vmatmul.mubr.msk.f32.gmra.mrb[2].mxu0 %vm192_vm0, %v2750_v24 }
  0xbb   :  { %2147 = vmatpush3.bf16.msra.mxu0 %v2144_v19  ;;  %1934 = vmatprep.mubr.msk.f32.mxu0 %vm192_vm0, %v162_v26 }
  0xbc   :  { %2149 = vmatprep.subr.bf16.mxu0 %v2148_v25  ;;  %2183 = vmatpush3.bf16.msra.mxu1 %v2797_v4 }
  0xbd   :  { %2184 = vmatprep.subr.bf16.mxu1 %v2547_v59 }
  0xbf   :  { %2151 = vmatpush3.bf16.msra.mxu0 %v2148_v25 }
  0xc0   :  { %2153 = vmatprep.subr.bf16.mxu0 %v2152_v29 }
  0xc3   :  { %2155 = vmatpush3.bf16.msra.mxu0 %v2152_v29 }
  0xc4   :  { %2157 = vmatprep.subr.bf16.mxu0 %v2156_v33 }
  0xc6   :  { %1935 = vmatmul.mubr.msk.f32.vlgmr.msra.gmra.mrb[0].mxu0 %vm192_vm0, %v156_v38 }
  0xc7   :  { %2159 = vmatpush3.bf16.msra.mxu0 %v2156_v33  ;;  %1937 = vmatprep.mubr.msk.f32.mxu0 %vm192_vm0, %v163_v42 }
  0xc8   :  { %2161 = vmatprep.subr.bf16.mxu0 %v2160_v41 }
  0xca   :  { %1938 = vmatmul.mubr.msk.f32.gmra.mrb[2].mxu0 %vm192_vm0, %v159_v45 }
  0xcb   :  { %2163 = vmatpush3.bf16.msra.mxu0 %v2160_v41  ;;  %1956 = vmatprep.mubr.msk.f32.mxu0 %vm192_vm0, %v167_v47 }
  0xcc   :  { %2165 = vmatprep.subr.bf16.mxu0 %v2164_v46 }
  0xcf   :  { %2167 = vmatpush3.bf16.msra.mxu0 %v2164_v46 }
  0xd0   :  { %2169 = vmatprep.subr.bf16.mxu0 %v2168_v50 }
  0xd3   :  { %2171 = vmatpush3.bf16.msra.mxu0 %v2168_v50 }
  0xd4   :  { %2244 = vmatprep.subr.bf16.mxu0 %v2547_v59 }
  0xd6   :  { %1957 = vmatmul.mubr.msk.f32.vlgmr.msra.gmra.mrb[0].mxu0 %vm192_vm0, %v173_v53 }
  0xd7   :  { %1959 = vmatprep.mubr.msk.f32.mxu0 %vm192_vm0, %v170_v54  ;;  %2246 = vmatpush3.bf16.msra.mxu0 %v2777_v58 }
  0xd8   :  { %2247 = vmatprep.subr.bf16.mxu0 %v2547_v59 }
  0xda   :  { %1960 = vmatmul.mubr.msk.f32.gmra.mrb[2].mxu0 %vm192_vm0, %v174_v55 }
  0xdb   :  { %2249 = vmatpush3.bf16.msra.mxu0 %v2785_v62  ;;  %2092 = vmatprep.mubr.msk.f32.mxu0 %vm2548_vm3, %v2549_v5 }
  0xdc   :  { %2250 = vmatprep.subr.bf16.mxu0 %v2547_v59 }
  0xdf   :  { %2252 = vmatpush3.bf16.msra.mxu0 %v2791_v1 }
  0xe0   :  { %2253 = vmatprep.subr.bf16.mxu0 %v2547_v59 }
  0xe3   :  { %2255 = vmatpush3.bf16.msra.mxu0 %v2797_v4 }
  0xe4   :  { %2256 = vmatprep.subr.bf16.mxu0 %v2547_v59 }
 0x1a9   :  { %v2807_v6 = vpop.f32.mrb[0].mxu0 }
 0x1aa   :  { %v490_v7 = vsel %vm192_vm0, %v2807_v6, 0.0  ;;  %v592_v9 = vmul.f32 %v2807_v6, %v2807_v6  ;;  %v2813_v10 = vpop.f32.mrb[1].mxu0 }
 0x1ab   :  { %v489_v11 = vsel %vm192_vm0, %v2813_v10, 0.0  ;;  %v591_v12 = vmul.f32 %v2813_v10, %v2813_v10 }
 0x1ac   :  { %v596_v13 = vsel %vm192_vm0, %v592_v9, 0.0  ;;  %v491_v14 = vadd.f32 %v490_v7, %v489_v11  ;;  %v1754_v11 = vld [vmem:[#allocation7] ss:$0 sm:$0xff] }
 0x1ad   :  { %v595_v15 = vsel %vm192_vm0, %v591_v12, 0.0  ;;  %v2821_v16 = vpop.f32.mrb[2].mxu0  ;;  %v974_v12 = vld [vmem:[#allocation10 + $0x40] sm:$0xff] }
 0x1ae   :  { %v492_v17 = vrot.slane %v491_v14, 4  ;;  %v597_v19 = vadd.f32 %v596_v13, %v595_v15  ;;  %v499_v21 = vsel %vm192_vm0, %v2821_v16, 0.0  ;;  %v594_v22 = vmul.f32 %v2821_v16, %v2821_v16  ;;  %v2827_v23 = vpop.f32.mrb[3].mxu0  ;;  %v975_v13 = vld [vmem:[#allocation10 + $0x48] sm:$0xff] }
 0x1af   :  { %v498_v25 = vsel %vm192_vm0, %v2827_v23, 0.0  ;;  %v593_v26 = vmul.f32 %v2827_v23, %v2827_v23 }
 0x1b0   :  { %v493_v27 = vadd.f32 %v492_v17, %v491_v14  ;;  %v598_v28 = vrot.slane %v597_v19, 4  ;;  %v605_v29 = vsel %vm192_vm0, %v594_v22, 0.0  ;;  %v500_v30 = vadd.f32 %v499_v21, %v498_v25  ;;  %v976_v25 = vld [vmem:[#allocation10 + $0x50] sm:$0xff] }
 0x1b1   :  { %v604_v31 = vsel %vm192_vm0, %v593_v26, 0.0  ;;  %v2196_v17 = vpack.c.bf16 %v975_v13, %v974_v12  ;;  %v977_v26 = vld [vmem:[#allocation10 + $0x58] sm:$0xff]  ;;  %v967_v12 = vld [vmem:[#allocation10 + $0x10] sm:$0xff] }
 0x1b2   :  { %v494_v32 = vrot.slane %v493_v27, 2  ;;  %v599_v33 = vadd.f32 %v598_v28, %v597_v19  ;;  %v501_v34 = vrot.slane %v500_v30, 4  ;;  %v606_v35 = vadd.f32 %v605_v29, %v604_v31  ;;  %v1755_v19 = vld [vmem:[#allocation8] ss:$0 sm:$0xff]  ;;  %v978_v28 = vld [vmem:[#allocation10 + $0x60] sm:$0xff]  ;;  %v979_v29 = vld [vmem:[#allocation10 + $0x68] sm:$0xff] }
 0x1b3   :  { %v980_v31 = vld [vmem:[#allocation10 + $0x70] sm:$0xff]  ;;  %v968_v13 = vld [vmem:[#allocation10 + $0x18] sm:$0xff] }
 0x1b4   :  { %v495_v36 = vadd.f32 %v494_v32, %v493_v27  ;;  %v600_v37 = vrot.slane %v599_v33, 2  ;;  %v502_v38 = vadd.f32 %v501_v34, %v500_v30  ;;  %v607_v39 = vrot.slane %v606_v35, 4  ;;  %v981_v32 = vld [vmem:[#allocation10 + $0x78] sm:$0xff]  ;;  %v965_v34 = vld [vmem:[#allocation10] sm:$0xff] }
 0x1b5   :  { %v2200_v27 = vpack.c.bf16 %v977_v26, %v976_v25  ;;  %v2204_v30 = vpack.c.bf16 %v979_v29, %v978_v28  ;;  %v970_v25 = vld [vmem:[#allocation10 + $0x28] sm:$0xff] }
 0x1b6   :  { %v601_v40 = vadd.f32 %v600_v37, %v599_v33  ;;  %v503_v41 = vrot.slane %v502_v38, 2  ;;  %v608_v42 = vadd.f32 %v607_v39, %v606_v35  ;;  %v496_v45 = vrot.slane %v495_v36, 1  ;;  %v966_v35 = vld [vmem:[#allocation10 + $0x8] sm:$0xff] }
 0x1b7   :  { %v2208_v33 = vpack.c.bf16 %v981_v32, %v980_v31  ;;  %v2550_v37 = vmov 1966171168   ;;  %v867_v39 = vlaneseq }
 0x1b8   :  { %v504_v43 = vadd.f32 %v503_v41, %v502_v38  ;;  %v609_v44 = vrot.slane %v608_v42, 2  ;;  %v602_v48 = vrot.slane %v601_v40, 1  ;;  %v497_v49 = vadd.f32 %v496_v45, %v495_v36 }
 0x1b9   :  { %v2212_v36 = vpack.c.bf16 %v966_v35, %v965_v34  ;;  %v865_v38 = vunpack.c.l.s4 %v2550_v37  ;;  %v868_v41 = vshrl.u32 %v867_v39, 7  ;;  %v972_v39 = vld [vmem:[#allocation10 + $0x38] sm:$0xff] }
 0x1ba   :  { %v610_v46 = vadd.f32 %v609_v44, %v608_v42  ;;  %v505_v47 = vrot.slane %v504_v43, 1  ;;  %v603_v53 = vadd.f32 %v602_v48, %v601_v40 }
 0x1bb   :  { %v866_v40 = vunpack.c.0.s8 %v865_v38  ;;  %v2865_v45 = vsub.s32 0, %v868_v41  ;;  %v971_v38 = vld [vmem:[#allocation10 + $0x30] sm:$0xff] }
 0x1bc   :  { %v506_v50 = vadd.f32 %v505_v47, %v504_v43  ;;  %v611_v51 = vrot.slane %v610_v46, 1 }
 0x1bd   :  { %v2862_v42 = vsub.s32 %v866_v40, %v868_v41  ;;  %v1171_v41 = vld [vmem:[#allocation10 + $0x80] sm:$0xff] }
 0x1be   :  { %v518_v52 = vsel %vm517_vm4, %v506_v50, %v497_v49  ;;  %v612_v54 = vadd.f32 %v611_v51, %v610_v46 }
 0x1bf   :  { %1979 = vmatmul.mubr.msk.f32.vlgmr.msra.gmra.mrb[0].mxu1 %vm192_vm0, %v518_v52 }
 0x1c0   :  { %2186 = vmatpush3.bf16.msra.mxu1 %v2777_v58  ;;  %1997 = vmatprep.mubr.msk.f32.mxu1 %vm2548_vm3, %v2549_v5  ;;  %v615_v55 = vsel %vm517_vm4, %v612_v54, %v603_v53 }
 0x1c1   :  { %2187 = vmatprep.subr.bf16.mxu1 %v2547_v59 }
 0x1c4   :  { %2189 = vmatpush3.bf16.msra.mxu1 %v2785_v62 }
 0x1c5   :  { %2190 = vmatprep.subr.bf16.mxu1 %v2547_v59 }
 0x1c8   :  { %2192 = vmatpush3.bf16.msra.mxu1 %v2791_v1 }
 0x1c9   :  { %2193 = vmatprep.subr.bf16.mxu1 %v2547_v59 }
 0x1cc   :  { %2195 = vmatpush3.bf16.msra.mxu1 %v2797_v4 }
 0x1cd   :  { %2000 = vmatprep.subr.mxu1 %v2549_v5 }
 0x1cf   :  { %1998 = vmatmul.mubr.msk.f32.vlgmr.msra.gmra.mrb[2].mxu1 %vm192_vm0, %v615_v55 }
 0x1d0   :  { %2002 = vmatprep.mubr.msk.f32.mxu1 %vm2548_vm3, %v2549_v5  ;;  %2001 = vmatpush3.msk.msra.mxu1 %vm716_vm5, %v2851_v56 }
 0x1d1   :  { %2005 = vmatprep.subr.mxu1 %v2549_v5 }
 0x292   :  { %v587_v57 = vpop.f32.mrb[0].mxu1 }
 0x293   :  { %v1980_v60 = vpop.f32.mrb[1].mxu1  ;;  %v688_v61 = vmul.f32 0.00390625, %v587_v57 }
 0x295   :  { %v690_v0 = vmul.f32 %v688_v61, %v688_v61 }
 0x2a2   :  { %v684_v63 = vpop.f32.mrb[2].mxu1 }
 0x2a3   :  { %v689_v2 = vmul.f32 0.00390625, %v684_v63  ;;  %v1999_v3 = vpop.f32.mrb[3].mxu1 }
 0x2a5   :  { %v691_v7 = vsub.f32 %v689_v2, %v690_v0 }
 0x2a7   :  { %v692_v9 = vadd.f32 1e-05, %v691_v7 }
 0x2a9   :  { %2300 = vrsqrt.f32 %v692_v9 }
 0x2b3   :  { %v2301_v14 = vpop.eup %2300 }
 0x2b4   :  { %v701_v15 = vmul.f32 %v2301_v14, %v1754_v11 }
 0x2b6   :  { %2003 = vmatmul.mubr.msk.f32.vlgmr.msra.gmra.mrb[4].mxu1 %vm712_vm6, %v701_v15  ;;  %v703_v21 = vmul.f32 %v701_v15, %v688_v61 }
 0x2b7   :  { %2006 = vmatpush3.msk.msra.mxu1 %vm716_vm5, %v2851_v56  ;;  %2007 = vmatprep.mubr.msk.f32.mxu1 %vm2548_vm3, %v2549_v5 }
 0x2b8   :  { %v710_v22 = vsub.f32 %v1755_v19, %v703_v21  ;;  %2197 = vmatprep.subr.bf16.mxu1 %v2196_v17  ;;  %v2216_v19 = vpack.c.bf16 %v968_v13, %v967_v12 }
 0x2ba   :  { %2008 = vmatmul.mubr.msk.f32.vlgmr.msra.gmra.mrb[6].mxu1 %vm712_vm6, %v710_v22  ;;  %v969_v22 = vld [vmem:[#allocation10 + $0x20] sm:$0xff] }
 0x2bb   :  { %2199 = vmatpush3.bf16.msra.mxu1 %v2196_v17  ;;  %v2220_v34 = vpack.c.bf16 %v970_v25, %v969_v22 }
 0x2bc   :  { %2201 = vmatprep.subr.bf16.mxu1 %v2200_v27 }
 0x2bf   :  { %2203 = vmatpush3.bf16.msra.mxu1 %v2200_v27 }
 0x2c0   :  { %2205 = vmatprep.subr.bf16.mxu1 %v2204_v30 }
 0x2c3   :  { %2207 = vmatpush3.bf16.msra.mxu1 %v2204_v30 }
 0x2c4   :  { %2209 = vmatprep.subr.bf16.mxu1 %v2208_v33 }
 0x2c7   :  { %2211 = vmatpush3.bf16.msra.mxu1 %v2208_v33 }
 0x2c8   :  { %2213 = vmatprep.subr.bf16.mxu1 %v2212_v36 }
 0x389   :  { %v786_v43 = vpop.f32.mrb[4].mxu1 }
 0x38a   :  { %v870_v44 = vrot.slane %v786_v43, %v2862_v42  ;;  %v2004_v46 = vpop.f32.mrb[5].mxu1  ;;  %v1172_v43 = vld [vmem:[#allocation10 + $0x88] sm:$0xff] }
 0x38b   :  { %v1173_v46 = vld [vmem:[#allocation10 + $0x90] sm:$0xff] }
 0x38c   :  { %v871_v47 = vcombine.high %v870_v44, %v870_v44  ;;  %v878_v48 = vrot.slane %v870_v44, %v2862_v42  ;;  %v2228_v44 = vpack.c.bf16 %v1172_v43, %v1171_v41 }
 0x38d   :  { %v859_v49 = vpop.f32.mrb[6].mxu1 }
 0x38e   :  { %v885_v50 = vrot.slane %v871_v47, %v2862_v42  ;;  %v889_v51 = vrot.slane %v878_v48, %v2865_v45  ;;  %v907_v52 = vrot.slane %v859_v49, %v2862_v42  ;;  %v2009_v53 = vpop.f32.mrb[7].mxu1  ;;  %v1174_v47 = vld [vmem:[#allocation10 + $0x98] sm:$0xff]  ;;  %v1175_v49 = vld [vmem:[#allocation10 + $0xa0] sm:$0xff] }
 0x38f   :  { %v2232_v48 = vpack.c.bf16 %v1174_v47, %v1173_v46  ;;  %v1177_v53 = vld [vmem:[#allocation10 + $0xb0] sm:$0xff] }
 0x390   :  { %v893_v54 = vrot.slane %v885_v50, %v2865_v45  ;;  %v896_v55 = vmul.f32 %v889_v51, %v2813_v10  ;;  %v897_v57 = vmul.f32 %v2807_v6, %v889_v51  ;;  %v908_v60 = vcombine.high %v907_v52, %v907_v52  ;;  %v1176_v50 = vld [vmem:[#allocation10 + $0xa8] sm:$0xff] }
 0x391   :  { %v915_v61 = vrot.slane %v907_v52, %v2862_v42  ;;  %v2236_v52 = vpack.c.bf16 %v1176_v50, %v1175_v49 }
 0x392   :  { %v898_v63 = vmul.f32 %v893_v54, %v2827_v23  ;;  %v899_v0 = vmul.f32 %v2821_v16, %v893_v54  ;;  %v922_v2 = vrot.slane %v908_v60, %v2862_v42  ;;  %v1178_v54 = vld [vmem:[#allocation10 + $0xb8] sm:$0xff] }
 0x393   :  { %v926_v3 = vrot.slane %v915_v61, %v2865_v45 }
 0x394   :  { %v930_v7 = vrot.slane %v922_v2, %v2865_v45 }
 0x395   :  { %v933_v9 = vadd.f32 %v926_v3, %v896_v55  ;;  %v934_v11 = vadd.f32 %v926_v3, %v897_v57  ;;  %v2240_v55 = vpack.c.bf16 %v1178_v54, %v1177_v53 }
 0x396   :  { %v935_v10 = vadd.f32 %v930_v7, %v898_v63  ;;  %v936_v14 = vadd.f32 %v930_v7, %v899_v0 }
 0x397   :  { %v937_v6 = vmax.f32 %v933_v9, 0.0  ;;  %v938_v15 = vmax.f32 %v934_v11, 0.0 }
 0x398   :  { %v939_v17 = vmax.f32 %v935_v10, 0.0  ;;  %v940_v21 = vmax.f32 %v936_v14, 0.0 }
 0x399   :  { %v946_v23 = vrot.slane %v938_v15, 7  ;;  %2026 = vmatprep.mubr.msk.f32.mxu1 %vm192_vm0, %v937_v6  ;;  %v945_v16 = vrot.slane %v937_v6, 7  ;;  %v955_v26 = vrot.slane %v937_v6, 1  ;;  %v956_v27 = vrot.slane %v938_v15, 1 }
 0x39a   :  { %2027 = vmatmul.mubr.msk.f32.vlgmr.msra.gmra.mrb[8].mxu1 %vm192_vm0, %v938_v15  ;;  %v948_v28 = vrot.slane %v939_v17, 7  ;;  %v949_v29 = vrot.slane %v940_v21, 7  ;;  %v958_v30 = vrot.slane %v939_v17, 1  ;;  %v959_v31 = vrot.slane %v940_v21, 1 }
 0x39b   :  { %2215 = vmatpush3.bf16.msra.mxu1 %v2212_v36  ;;  %2029 = vmatprep.mubr.msk.f32.mxu1 %vm192_vm0, %v939_v17  ;;  %v947_v32 = vsel %vm153_vm1, %v945_v16, %v946_v23  ;;  %v957_v33 = vsel %vm164_vm2, %v955_v26, %v956_v27  ;;  %v953_v40 = vsel %vm153_vm1, 0.0, %v945_v16  ;;  %v2224_v36 = vpack.c.bf16 %v972_v39, %v971_v38 }
 0x39c   :  { %2217 = vmatprep.subr.bf16.mxu1 %v2216_v19  ;;  %v950_v35 = vsel %vm153_vm1, %v948_v28, %v949_v29  ;;  %v960_v37 = vsel %vm164_vm2, %v958_v30, %v959_v31  ;;  %v954_v51 = vsel %vm153_vm1, 0.0, %v948_v28  ;;  %v963_v57 = vsel %vm164_vm2, %v956_v27, 0.0 }
 0x39d   :  { %v964_v60 = vsel %vm164_vm2, %v959_v31, 0.0 }
 0x39e   :  { %2030 = vmatmul.mubr.msk.f32.gmra.mrb[10].mxu1 %vm192_vm0, %v940_v21 }
 0x39f   :  { %2219 = vmatpush3.bf16.msra.mxu1 %v2216_v19  ;;  %2048 = vmatprep.mubr.msk.f32.mxu1 %vm192_vm0, %v953_v40 }
 0x3a0   :  { %2221 = vmatprep.subr.bf16.mxu1 %v2220_v34 }
 0x3a3   :  { %2223 = vmatpush3.bf16.msra.mxu1 %v2220_v34 }
 0x3a4   :  { %2225 = vmatprep.subr.bf16.mxu1 %v2224_v36 }
 0x3a7   :  { %2227 = vmatpush3.bf16.msra.mxu1 %v2224_v36 }
 0x3a8   :  { %2229 = vmatprep.subr.bf16.mxu1 %v2228_v44 }
 0x3aa   :  { %2049 = vmatmul.mubr.msk.f32.vlgmr.msra.gmra.mrb[8].mxu1 %vm192_vm0, %v947_v32 }
 0x3ab   :  { %2051 = vmatprep.mubr.msk.f32.mxu1 %vm192_vm0, %v954_v51  ;;  %2231 = vmatpush3.bf16.msra.mxu1 %v2228_v44 }
 0x3ac   :  { %2233 = vmatprep.subr.bf16.mxu1 %v2232_v48 }
 0x3ae   :  { %2052 = vmatmul.mubr.msk.f32.gmra.mrb[10].mxu1 %vm192_vm0, %v950_v35 }
 0x3af   :  { %2235 = vmatpush3.bf16.msra.mxu1 %v2232_v48  ;;  %2070 = vmatprep.mubr.msk.f32.mxu1 %vm192_vm0, %v957_v33 }
 0x3b0   :  { %2237 = vmatprep.subr.bf16.mxu1 %v2236_v52 }
 0x3b3   :  { %2239 = vmatpush3.bf16.msra.mxu1 %v2236_v52 }
 0x3b4   :  { %2241 = vmatprep.subr.bf16.mxu1 %v2240_v55 }
 0x3b7   :  { %2243 = vmatpush3.bf16.msra.mxu1 %v2240_v55 }
 0x3ba   :  { %2071 = vmatmul.mubr.msk.f32.vlgmr.msra.gmra.mrb[8].mxu1 %vm192_vm0, %v963_v57 }
 0x3bb   :  { %2073 = vmatprep.mubr.msk.f32.mxu1 %vm192_vm0, %v960_v37 }
 0x3be   :  { %2074 = vmatmul.mubr.msk.f32.gmra.mrb[10].mxu1 %vm192_vm0, %v964_v60  ;;  %v1774_v60 = vld [vmem:[#allocation11] ss:$0 sm:$0xff] }
 0x48d   :  { %v2900_v61 = vpop.f32.mrb[8].mxu1 }
 0x48e   :  { %v1279_v63 = vsel %vm192_vm0, %v2900_v61, 0.0  ;;  %v1372_v0 = vmul.f32 %v2900_v61, %v2900_v61  ;;  %v2906_v2 = vpop.f32.mrb[9].mxu1 }
 0x48f   :  { %v1278_v3 = vsel %vm192_vm0, %v2906_v2, 0.0  ;;  %v1371_v7 = vmul.f32 %v2906_v2, %v2906_v2 }
 0x490   :  { %v1376_v9 = vsel %vm192_vm0, %v1372_v0, 0.0  ;;  %v1280_v11 = vadd.f32 %v1279_v63, %v1278_v3  ;;  %v1775_v3 = vld [vmem:[#allocation13] ss:$0 sm:$0xff] }
 0x491   :  { %v1375_v12 = vsel %vm192_vm0, %v1371_v7, 0.0  ;;  %v2914_v13 = vpop.f32.mrb[10].mxu1 }
 0x492   :  { %v1281_v10 = vrot.slane %v1280_v11, 4  ;;  %v1377_v14 = vadd.f32 %v1376_v9, %v1375_v12  ;;  %v1288_v6 = vsel %vm192_vm0, %v2914_v13, 0.0  ;;  %v1374_v15 = vmul.f32 %v2914_v13, %v2914_v13  ;;  %v2920_v17 = vpop.f32.mrb[11].mxu1 }
 0x493   :  { %v1287_v19 = vsel %vm192_vm0, %v2920_v17, 0.0  ;;  %v1373_v21 = vmul.f32 %v2920_v17, %v2920_v17 }
 0x494   :  { %v1282_v23 = vadd.f32 %v1281_v10, %v1280_v11  ;;  %v1378_v16 = vrot.slane %v1377_v14, 4  ;;  %v1385_v22 = vsel %vm192_vm0, %v1374_v15, 0.0  ;;  %v1289_v25 = vadd.f32 %v1288_v6, %v1287_v19 }
 0x495   :  { %v1384_v26 = vsel %vm192_vm0, %v1373_v21, 0.0 }
 0x496   :  { %v1283_v27 = vrot.slane %v1282_v23, 2  ;;  %v1379_v28 = vadd.f32 %v1378_v16, %v1377_v14  ;;  %v1290_v29 = vrot.slane %v1289_v25, 4  ;;  %v1386_v30 = vadd.f32 %v1385_v22, %v1384_v26 }
 0x498   :  { %v1284_v31 = vadd.f32 %v1283_v27, %v1282_v23  ;;  %v1380_v32 = vrot.slane %v1379_v28, 2  ;;  %v1291_v33 = vadd.f32 %v1290_v29, %v1289_v25  ;;  %v1387_v34 = vrot.slane %v1386_v30, 4 }
 0x49a   :  { %v1381_v35 = vadd.f32 %v1380_v32, %v1379_v28  ;;  %v1292_v37 = vrot.slane %v1291_v33, 2  ;;  %v1388_v38 = vadd.f32 %v1387_v34, %v1386_v30  ;;  %v1285_v39 = vrot.slane %v1284_v31, 1 }
 0x49c   :  { %v1293_v40 = vadd.f32 %v1292_v37, %v1291_v33  ;;  %v1389_v36 = vrot.slane %v1388_v38, 2  ;;  %v1382_v44 = vrot.slane %v1381_v35, 1  ;;  %v1286_v46 = vadd.f32 %v1285_v39, %v1284_v31 }
 0x49e   :  { %v1294_v41 = vrot.slane %v1293_v40, 1  ;;  %v1390_v43 = vadd.f32 %v1389_v36, %v1388_v38  ;;  %v1383_v50 = vadd.f32 %v1382_v44, %v1381_v35 }
 0x4a0   :  { %v1295_v47 = vadd.f32 %v1294_v41, %v1293_v40  ;;  %v1391_v48 = vrot.slane %v1390_v43, 1 }
 0x4a2   :  { %v1298_v49 = vsel %vm517_vm4, %v1295_v47, %v1286_v46  ;;  %v1392_v51 = vadd.f32 %v1391_v48, %v1390_v43 }
 0x4a3   :  { %2093 = vmatmul.mubr.msk.f32.vlgmr.msra.gmra.mrb[4].mxu0 %vm192_vm0, %v1298_v49 }
 0x4a4   :  { %2258 = vmatpush3.bf16.msra.mxu0 %v2777_v58  ;;  %2111 = vmatprep.mubr.msk.f32.mxu0 %vm2548_vm3, %v2549_v5  ;;  %v1395_v52 = vsel %vm517_vm4, %v1392_v51, %v1383_v50 }
 0x4a5   :  { %2259 = vmatprep.subr.bf16.mxu0 %v2547_v59 }
 0x4a8   :  { %2261 = vmatpush3.bf16.msra.mxu0 %v2785_v62 }
 0x4a9   :  { %2262 = vmatprep.subr.bf16.mxu0 %v2547_v59 }
 0x4ac   :  { %2264 = vmatpush3.bf16.msra.mxu0 %v2791_v1 }
 0x4ad   :  { %2265 = vmatprep.subr.bf16.mxu0 %v2547_v59 }
 0x4b0   :  { %2267 = vmatpush3.bf16.msra.mxu0 %v2797_v4 }
 0x4b1   :  { %2114 = vmatprep.subr.mxu0 %v2549_v5 }
 0x4b3   :  { %2112 = vmatmul.mubr.msk.f32.vlgmr.msra.gmra.mrb[6].mxu0 %vm192_vm0, %v1395_v52 }
 0x4b4   :  { %2115 = vmatpush3.msk.msra.mxu0 %vm716_vm5, %v2851_v56  ;;  %2116 = vmatprep.mubr.msk.f32.mxu0 %vm2548_vm3, %v2549_v5 }
 0x4b5   :  { %2119 = vmatprep.subr.mxu0 %v2549_v5 }
 0x576   :  { %v1367_v58 = vpop.f32.mrb[4].mxu0 }
 0x577   :  { %v2094_v62 = vpop.f32.mrb[5].mxu0  ;;  %v1468_v53 = vmul.f32 0.00390625, %v1367_v58 }
 0x579   :  { %v1470_v54 = vmul.f32 %v1468_v53, %v1468_v53 }
 0x586   :  { %v1464_v1 = vpop.f32.mrb[6].mxu0 }
 0x587   :  { %v1469_v59 = vmul.f32 0.00390625, %v1464_v1  ;;  %v2113_v55 = vpop.f32.mrb[7].mxu0 }
 0x589   :  { %v1471_v4 = vsub.f32 %v1469_v59, %v1470_v54 }
 0x58b   :  { %v1472_v57 = vadd.f32 1e-05, %v1471_v4 }
 0x58d   :  { %2302 = vrsqrt.f32 %v1472_v57 }
 0x597   :  { %v2303_v63 = vpop.eup %2302 }
 0x598   :  { %v1481_v0 = vmul.f32 %v2303_v63, %v1774_v60 }
 0x59a   :  { %2117 = vmatmul.mubr.msk.f32.vlgmr.msra.gmra.mrb[8].mxu0 %vm712_vm6, %v1481_v0  ;;  %v1483_v7 = vmul.f32 %v1481_v0, %v1468_v53 }
 0x59b   :  { %2120 = vmatpush3.msk.msra.mxu0 %vm716_vm5, %v2851_v56  ;;  %2121 = vmatprep.mubr.msk.f32.mxu0 %vm2548_vm3, %v2549_v5 }
 0x59c   :  { %v1490_v9 = vsub.f32 %v1775_v3, %v1483_v7 }
 0x59e   :  { %2122 = vmatmul.mubr.msk.f32.vlgmr.msra.gmra.mrb[10].mxu0 %vm712_vm6, %v1490_v9 }
 0x66d   :  { %v1560_v11 = vpop.f32.mrb[8].mxu0 }
 0x66e   :  { %v1644_v12 = vrot.slane %v1560_v11, %v2862_v42  ;;  %v2118_v10 = vpop.f32.mrb[9].mxu0 }
 0x670   :  { %v1645_v14 = vcombine.high %v1644_v12, %v1644_v12  ;;  %v1652_v6 = vrot.slane %v1644_v12, %v2862_v42 }
 0x671   :  { %v1633_v15 = vpop.f32.mrb[10].mxu0 }
 0x672   :  { %v1659_v19 = vrot.slane %v1645_v14, %v2862_v42  ;;  %v1663_v21 = vrot.slane %v1652_v6, %v2865_v45  ;;  %v1681_v56 = vrot.slane %v1633_v15, %v2862_v42  ;;  %v2123_v23 = vpop.f32.mrb[11].mxu0 }
 0x674   :  { %v1667_v5 = vrot.slane %v1659_v19, %v2865_v45  ;;  %v1670_v16 = vmul.f32 %v1663_v21, %v2906_v2  ;;  %v1671_v22 = vmul.f32 %v2900_v61, %v1663_v21  ;;  %v1682_v25 = vcombine.high %v1681_v56, %v1681_v56 }
 0x675   :  { %v1689_v26 = vrot.slane %v1681_v56, %v2862_v42 }
 0x676   :  { %v1672_v27 = vmul.f32 %v1667_v5, %v2920_v17  ;;  %v1673_v28 = vmul.f32 %v2914_v13, %v1667_v5  ;;  %v1696_v29 = vrot.slane %v1682_v25, %v2862_v42 }
 0x677   :  { %v1700_v30 = vrot.slane %v1689_v26, %v2865_v45 }
 0x678   :  { %v1704_v31 = vrot.slane %v1696_v29, %v2865_v45 }
 0x679   :  { %v1707_v32 = vadd.f32 %v1700_v30, %v1670_v16  ;;  %v1708_v33 = vadd.f32 %v1700_v30, %v1671_v22 }
 0x67a   :  { %v1709_v2 = vadd.f32 %v1704_v31, %v1672_v27  ;;  %v1710_v34 = vadd.f32 %v1704_v31, %v1673_v28 }
 0x67b   :  { %v1711_v61 = vadd.f32 %v1707_v32, %v2737_v8  ;;  %v1712_v35 = vadd.f32 %v1708_v33, %v2741_v18 }
 0x67c   :  { %v1713_v17 = vadd.f32 %v1709_v2, %v2743_v20  ;;  %v1714_v13 = vadd.f32 %v1710_v34, %v2750_v24 }
 0x67d   :  { %1715 = vst.msk [vmem:[#allocation17] sm:$0xff] %vm192_vm0, %v1711_v61  ;;  %1716 = vst.msk [vmem:[#allocation17 + $0x8] sm:$0xff] %vm192_vm0, %v1712_v35 }
 0x67e   :  { %1717 = vst.msk [vmem:[#allocation17 + $0x10] sm:$0xff] %vm192_vm0, %v1713_v17  ;;  %1718 = vst.msk [vmem:[#allocation17 + $0x18] sm:$0xff] %vm192_vm0, %v1714_v13 }
 0x67f   :  { %2513 = shalt.err (!%p2510_p6)
}
 0x680   :  { %s2514_s11 = scalar_lea.hbm %s2999_s9, 512 }
 0x681   :  { %p2515_p7 = scmp.ne.s32.totalorder %s2999_s9, %s2514_s11  ;;  %p2518_p8 = scmp.lt.u32.totalorder %s2514_s11, %s2999_s9 }
 0x683   :  { %p2520_p9 = pnand %p2518_p8, %p2515_p7 }
 0x685   :  { %2523 = shalt.err (!%p2520_p9)
}
 0x686   :  { %1730 = dma.vmem_to_hbm [thread:$0]  %s1725_s18, 512, %s2999_s9, [#allocation4], %s2538_s21, %s2538_s21, %s2539_s22  }
 0x687   :  { %2534 = dma.done.wait [#allocation4], 512  }
 0x688   :  { %2535 = vsyncadd [#allocation4], 4294966784 }
 0x689   :  { %1734 = vsyncpa [#allocation3], 1 }
 0x68a   :  { %1735 = vsyncpa [#allocation6], 1 }
 0x68b   :  { %1736 = vsyncpa [#allocation9], 1 }
 0x68c   :  { %1737 = vsyncpa [#allocation12], 1 }
 0x68d   :  { %1738 = vsyncpa [#allocation15], 1 }
 0x68e   :  { %1739 = vsyncpa [#allocation4], 1 }

</bundles_post_ra>
